<compile_context>
chip_gen: v6e
topology: v6e:2x2x1
jax: 0.10.0
libtpu: 0.0.40
codegen_flags: <defaults>
</compile_context>

<pallas_src>
import math

import jax
import jax.numpy as jnp
from jax.experimental import pallas as pl
from jax.experimental.pallas import tpu as pltpu

BF16 = jnp.bfloat16
F32 = jnp.float32


# ---------------------------------------------------------------------------
# tiling helpers
# ---------------------------------------------------------------------------
def _tc_per_chip():
    try:
        kind = jax.devices()[0].device_kind.lower()
        return 2 if ("v7" in kind or "7x" in kind) else 1
    except Exception:
        return 1


def _pick_tiles(m, min_steps=1):
    """(padded_rows, row_tile): largest lane-dense tile (<=8192) with bounded padding
    waste; >= min_steps grid steps (2 on v7x so the row grid shards over both TCs)."""
    m = max(int(m), 1)
    for t in (8192, 4096, 2048, 1024, 512, 256, 128):
        steps = max(-(-m // t), min_steps)
        mp = steps * t
        if mp - m <= max(m // 4, 511) or t == 128:
            return mp, t
    return -(-m // 128) * 128, 128  # unreachable


def _row_tiled_call(kernel, tiled_args, full_args, out_feat, tm, out_dtype=F32):
    """Run `kernel` over a 1-D parallel grid tiling the last (row/lane) axis by tm.

    tiled_args: [features_i, Mp] arrays, tiled along axis 1 (lane-dense blocks).
    full_args:  small 2-D weights / biases, passed whole to every grid step.
    """
    mp = tiled_args[0].shape[1]
    in_specs = (
        [pl.BlockSpec((a.shape[0], tm), lambda i: (0, i)) for a in tiled_args]
        + [pl.BlockSpec(a.shape, lambda i: (0, 0)) for a in full_args]
    )
    return pl.pallas_call(
        kernel,
        out_shape=jax.ShapeDtypeStruct((out_feat, mp), out_dtype),
        grid=(mp // tm,),
        in_specs=in_specs,
        out_specs=pl.BlockSpec((out_feat, tm), lambda i: (0, i)),
        compiler_params=pltpu.CompilerParams(
            dimension_semantics=("parallel",),
            vmem_limit_bytes=32 * 1024 * 1024,   # usage is small even at tm=8192
        ),
    )(*tiled_args, *full_args)


# ---------------------------------------------------------------------------
# Pallas kernels (transposed layout: y = W @ x, x is [features, rows])
# bf16 operands on the MXU, f32 accumulation, bias/relu in f32.
# ---------------------------------------------------------------------------
def _encoder_kernel(x_ref, w1_ref, b1_ref, w2_ref, b2_ref, o_ref):
    # x: (1, tm) f32; fan_in == 1 -> first layer is a VPU broadcast-FMA (no MXU).
    h = jnp.maximum(w1_ref[...] * x_ref[...] + b1_ref[...], 0.0)
    o = jnp.dot(w2_ref[...], h.astype(BF16),
                preferred_element_type=jnp.float32) + b2_ref[...]
    o_ref[...] = o.astype(o_ref.dtype)


def _edge_block_kernel(s_ref, r_ref, e_ref,
                       w1s_ref, w1r_ref, w1e_ref, b1_ref, w2_ref, b2_ref, o_ref):
    # concat([sender, receiver, edge]) @ W1^T as a sum of partial bf16 dots.
    h = jnp.dot(w1s_ref[...], s_ref[...], preferred_element_type=jnp.float32)
    h = h + jnp.dot(w1r_ref[...], r_ref[...], preferred_element_type=jnp.float32)
    h = h + jnp.dot(w1e_ref[...], e_ref[...], preferred_element_type=jnp.float32)
    h = jnp.maximum(h + b1_ref[...], 0.0)
    o = jnp.dot(w2_ref[...], h.astype(BF16),
                preferred_element_type=jnp.float32) + b2_ref[...]
    o_ref[...] = o.astype(o_ref.dtype)


def _edge_block0_kernel(s_ref, r_ref, a_ref,
                        ew1_ref, eb1_ref, ew2_ref, eb2_ref,
                        w1s_ref, w1r_ref, w1e_ref, b1_ref, w2_ref, b2_ref, o_ref):
    # Edge encoder (1 -> L -> L) fused into the first GraphNet edge block.
    e = jnp.maximum(ew1_ref[...] * a_ref[...] + eb1_ref[...], 0.0)
    e = jnp.dot(ew2_ref[...], e.astype(BF16),
                preferred_element_type=jnp.float32) + eb2_ref[...]
    h = jnp.dot(w1s_ref[...], s_ref[...], preferred_element_type=jnp.float32)
    h = h + jnp.dot(w1r_ref[...], r_ref[...], preferred_element_type=jnp.float32)
    h = h + jnp.dot(w1e_ref[...], e.astype(BF16), preferred_element_type=jnp.float32)
    h = jnp.maximum(h + b1_ref[...], 0.0)
    o = jnp.dot(w2_ref[...], h.astype(BF16),
                preferred_element_type=jnp.float32) + b2_ref[...]
    o_ref[...] = o.astype(o_ref.dtype)


def _node_block_kernel(x_ref, ssum_ref, icnt_ref,
                       w1x_ref, w1a_ref, b1_ref, w2_ref, b2_ref, o_ref):
    # Mean aggregation folded into the dot:  W1a @ (ssum * icnt) == (W1a @ ssum) * icnt
    # (icnt is constant per column).  No divides, no per-step recompute of 1/count.
    hx = jnp.dot(w1x_ref[...], x_ref[...], preferred_element_type=jnp.float32)
    ha = jnp.dot(w1a_ref[...], ssum_ref[...], preferred_element_type=jnp.float32)
    h = jnp.maximum(hx + ha * icnt_ref[...] + b1_ref[...], 0.0)
    o = jnp.dot(w2_ref[...], h.astype(BF16),
                preferred_element_type=jnp.float32) + b2_ref[...]
    o_ref[...] = o.astype(o_ref.dtype)


def _decoder_kernel(x_ref, diag_ref, attr_ref,
                    w1_ref, b1_ref, w2t_ref, b2_ref, o_ref):
    # decoder_edges (L -> L -> 1) with transform_output_matrix diag epilogue fused.
    h = jnp.maximum(
        jnp.dot(w1_ref[...], x_ref[...], preferred_element_type=jnp.float32)
        + b1_ref[...], 0.0)
    # (1, L) @ (L, tm) done as a sublane reduction -> avoids an M=1 MXU pass.
    y = jnp.sum(w2t_ref[...] * h, axis=0, keepdims=True) + b2_ref[...]
    is_diag = diag_ref[...] > 0.5
    safe_attr = jnp.where(is_diag, attr_ref[...], 1.0)   # no sqrt(neg) on masked lanes
    o = jnp.where(is_diag, 0.5 * jnp.sqrt(safe_attr), y)
    o_ref[...] = o.astype(o_ref.dtype)


# ---------------------------------------------------------------------------
# Parameters (mirror torch.nn.Linear init; weights stored as (out, in), f32)
# ---------------------------------------------------------------------------
def _linear_params(key, fan_in, fan_out):
    kw, kb = jax.random.split(key)
    bound = 1.0 / math.sqrt(float(fan_in))
    w = jax.random.uniform(kw, (fan_out, fan_in), F32, -bound, bound)
    b = jax.random.uniform(kb, (fan_out, 1), F32, -bound, bound)
    return w, b


def init_neuralpcg_params(key, *, latent_size, message_passing_steps):
    L = latent_size
    keys = iter(jax.random.split(key, 6 + 4 * message_passing_steps))

    def mlp2(fan_in, hidden, fan_out):
        w1, b1 = _linear_params(next(keys), fan_in, hidden)
        w2, b2 = _linear_params(next(keys), hidden, fan_out)
        return w1, b1, w2, b2

    params = {}
    params["enc_nodes"] = mlp2(1, L, L)
    params["enc_edges"] = mlp2(1, L, L)
    mp = []
    for _ in range(message_passing_steps):
        ew1, eb1, ew2, eb2 = mlp2(3 * L, L, L)
        nw1, nb1, nw2, nb2 = mlp2(2 * L, L, L)
        mp.append({
            # edge_block W1 split per concat component [sender, receiver, edge_attr]
            "edge": (ew1[:, :L], ew1[:, L:2 * L], ew1[:, 2 * L:], eb1, ew2, eb2),
            # node_block W1 split per concat component [x, aggregation]
            "node": (nw1[:, :L], nw1[:, L:], nb1, nw2, nb2),
        })
    params["mp"] = mp
    dw1, db1, dw2, db2 = mlp2(L, L, 1)
    params["dec"] = (dw1, db1, dw2.T, db2)     # final weight stored as (L, 1)
    return params


# ---------------------------------------------------------------------------
# symmetric COO -> upper-triangular coalesced COO (XLA glue, static shapes)
# ---------------------------------------------------------------------------
def _coalesce_upper_coo(row, col, vals, n):
    """Symmetrize, keep row<=col, sum duplicate indices. Returns padded COO:
    indices (2, 2E) int32, values (2E,) f32, nnz; entries beyond nnz are zero."""
    sym_r = jnp.concatenate([row, col])
    sym_c = jnp.concatenate([col, row])
    sym_v = jnp.concatenate([vals, vals])
    keep = sym_r <= sym_c
    key_r = jnp.where(keep, sym_r, n)            # dropped entries -> sentinel (n, n)
    key_c = jnp.where(keep, sym_c, n)
    order = jnp.lexsort((key_c, key_r))          # primary row, secondary col
    sr, sc = key_r[order], key_c[order]
    sv = jnp.where(keep, sym_v, 0.0)[order]
    new_seg = jnp.concatenate(
        [jnp.ones((1,), bool), (sr[1:] != sr[:-1]) | (sc[1:] != sc[:-1])])
    seg_id = jnp.cumsum(new_seg.astype(jnp.int32)) - 1
    m = sym_r.shape[0]
    out_v = jnp.zeros((m,), vals.dtype).at[seg_id].add(sv)
    out_r = jnp.zeros((m,), jnp.int32).at[seg_id].set(sr)
    out_c = jnp.zeros((m,), jnp.int32).at[seg_id].set(sc)
    nnz = jnp.sum(new_seg & (sr < n))
    return jnp.stack([out_r, out_c]), out_v, nnz


# ---------------------------------------------------------------------------
# NeuralPCG forward
# ---------------------------------------------------------------------------
def neuralpcg_forward(params, x, edge_index, edge_attr):
    L = params["enc_nodes"][2].shape[0]
    N = x.shape[0]
    E = edge_attr.shape[0]
    row = edge_index[0].astype(jnp.int32)
    col = edge_index[1].astype(jnp.int32)

    # One-time padding to lane-dense sizes; >=2 grid steps only on v7x (2 TCs).
    min_steps = 2 if _tc_per_chip() >= 2 else 1
    Np, tn = _pick_tiles(N + 1, min_steps)   # +1: spare node absorbs padded edges
    Ep, te = _pick_tiles(E, min_steps)
    pad_node = N
    row_p = jnp.full((Ep,), pad_node, jnp.int32).at[:E].set(row)
    col_p = jnp.full((Ep,), pad_node, jnp.int32).at[:E].set(col)

    # Transposed lane-dense inputs: [features, rows].
    x_t = jnp.zeros((1, Np), F32).at[0, :N].set(x[:, 0])
    ea_t = jnp.zeros((1, Ep), F32).at[0, :E].set(edge_attr[:, 0])
    is_diag = ((row_p == col_p) & (jnp.arange(Ep) < E)).astype(F32)[None, :]

    # bf16 weights for single-pass MXU matmuls; biases stay f32.
    enw1, enb1, enw2, enb2 = params["enc_nodes"]
    eew1, eeb1, eew2, eeb2 = params["enc_edges"]
    enc_nodes_w = [enw1, enb1, enw2.astype(BF16), enb2]
    enc_edges_w = [eew1, eeb1, eew2.astype(BF16), eeb2]

    # Node encoder (1 -> L -> L); output kept bf16 in HBM.
    latent_nodes = _row_tiled_call(_encoder_kernel, [x_t], enc_nodes_w, L, tn, BF16)

    # In-degree reciprocal, computed ONCE (constant across MP steps).
    counts = jnp.zeros((1, Np), F32).at[0, row_p].add(1.0)
    inv_counts = 1.0 / jnp.maximum(counts, 1.0)

    latent_edges = None
    if not params["mp"]:   # no message passing: need the standalone edge encoder
        latent_edges = _row_tiled_call(_encoder_kernel, [ea_t], enc_edges_w, L, te, BF16)

    # Message passing (GraphNet, mean aggregation).
    for step, p in enumerate(params["mp"]):
        w1s, w1r, w1e, b1, w2, b2 = p["edge"]
        edge_w = [w1s.astype(BF16), w1r.astype(BF16), w1e.astype(BF16), b1,
                  w2.astype(BF16), b2]
        nw1x, nw1a, nb1, nw2, nb2 = p["node"]
        node_w = [nw1x.astype(BF16), nw1a.astype(BF16), nb1, nw2.astype(BF16), nb2]

        # TODO(synk): per-edge gather and the segment scatter-add remain XLA glue;
        # a VMEM-resident / sorted-edge in-kernel gather + segment-sum is the next
        # step (data-dependent lane gather not fused here).
        sender = jnp.take(latent_nodes, row_p, axis=1)      # (L, Ep) bf16
        receiver = jnp.take(latent_nodes, col_p, axis=1)    # (L, Ep) bf16
        if step == 0:
            # edge encoder fused into the first edge block
            latent_edges = _row_tiled_call(_edge_block0_kernel,
                                           [sender, receiver, ea_t],
                                           enc_edges_w + edge_w, L, te, BF16)
        else:
            latent_edges = _row_tiled_call(_edge_block_kernel,
                                           [sender, receiver, latent_edges],
                                           edge_w, L, te, BF16)
        seg_sum = jnp.zeros((L, Np), BF16).at[:, row_p].add(latent_edges)
        latent_nodes = _row_tiled_call(_node_block_kernel,
                                       [latent_nodes, seg_sum, inv_counts],
                                       node_w, L, tn, BF16)

    # Decoder (L -> L -> 1) with fused diagonal replacement (f32 output).
    dw1, db1, dw2t, db2 = params["dec"]
    dec_w = [dw1.astype(BF16), db1, dw2t, db2]
    decoded = _row_tiled_call(_decoder_kernel, [latent_edges, is_diag, ea_t],
                              dec_w, 1, te, F32)
    edge_values = decoded[0, :E]

    # transform_output_matrix: symmetric COO, keep row<=col, coalesce (sum dups).
    # Returned as coalesced COO (indices, values, nnz) instead of a dense (N, N)
    # scatter; the transpose is just the index rows swapped.
    # TODO(synk): torch.sparse_coo_tensor has no direct JAX equivalent; this padded
    # COO (entries beyond nnz are zero) is the closest static-shape representation.
    indices, values, nnz = _coalesce_upper_coo(row, col, edge_values, N)
    return (indices, values, nnz), (indices[::-1], values, nnz), None


# ---------------------------------------------------------------------------
# Example run
# ---------------------------------------------------------------------------
if __name__ == "__main__":
    key = jax.random.PRNGKey(0)
    k_param, k_diag = jax.random.split(key)

    LATENT, MP_STEPS = 32, 2
    params = init_neuralpcg_params(k_param, latent_size=LATENT,
                                   message_passing_steps=MP_STEPS)

    # Small SPD-like sparse matrix as a graph: N=16 nodes, self-loops + tridiagonal.
    N = 16
    self_idx = jnp.arange(N, dtype=jnp.int32)
    lo = jnp.arange(N - 1, dtype=jnp.int32)
    hi = lo + 1
    rows = jnp.concatenate([self_idx, lo, hi])
    cols = jnp.concatenate([self_idx, hi, lo])
    edge_index = jnp.stack([rows, cols], axis=0)                      # (2, 46)

    diag_vals = 2.0 + jax.random.uniform(k_diag, (N,), jnp.float32)   # positive diag
    offdiag = -jnp.ones((N - 1,), jnp.float32)
    edge_attr = jnp.concatenate([diag_vals, offdiag, offdiag])[:, None]   # (46, 1)
    x = diag_vals[:, None]                                            # data.x (16, 1)

    fwd = jax.jit(neuralpcg_forward)
    (idx, vals, nnz), (idx_t, vals_t, _), _ = fwd(params, x, edge_index, edge_attr)
    vals = jax.block_until_ready(vals)

    nnz = int(nnz)
    idx = idx[:, :nnz]
    v = vals[:nnz]
    dense_upper = jnp.zeros((N, N), jnp.float32).at[idx[0], idx[1]].add(v)

    ok = bool(jnp.all(jnp.isfinite(vals)))
    ok &= (nnz == N + (N - 1))                                  # 16 diag + 15 upper
    # coalesce sums the two symmetric diag copies: 2 * 0.5*sqrt(a_ii) == sqrt(a_ii)
    ok &= bool(jnp.allclose(jnp.diag(dense_upper), jnp.sqrt(diag_vals), atol=1e-4))
    assert ok
    print("KERNEL_OK")
</pallas_src>

<mosaic_0001>
module attributes {stable_mosaic.version = 11 : i64} {
  func.func private @main(%arg0: i32) attributes {dimension_semantics = [#tpu.dimension_semantics<core_parallel>], iteration_bounds = array<i64: 2>, tpu.core_type = #tpu.core_type<sc_scalar_subcore>, window_params = []} {
    return
  }
}

module attributes {stable_mosaic.version = 11 : i64} {
  func.func private @main(%arg0: i32) attributes {dimension_semantics = [#tpu.dimension_semantics<core_parallel>], iteration_bounds = array<i64: 2>, tpu.core_type = #tpu.core_type<sc_scalar_subcore>, window_params = []} {
    return
  }
}

module attributes {stable_mosaic.version = 11 : i64} {
  func.func @_encoder_kernel(%arg0: i32, %arg1: memref<1x512xf32, #tpu.memory_space<vmem>>, %arg2: memref<32x1xf32, #tpu.memory_space<vmem>>, %arg3: memref<32x1xf32, #tpu.memory_space<vmem>>, %arg4: memref<32x32xbf16, #tpu.memory_space<vmem>>, %arg5: memref<32x1xf32, #tpu.memory_space<vmem>>, %arg6: memref<32x512xbf16, #tpu.memory_space<vmem>>) attributes {dimension_semantics = [#tpu.dimension_semantics<parallel>], iteration_bounds = array<i64: 1>, scalar_prefetch = 0 : i64, scratch_operands = 0 : i64, tpu.core_type = #tpu.core_type<tc>, window_params = [{transform_indices = @transform_0, window_bounds = array<i64: 1, 512>}, {pipeline_mode = #tpu.pipeline_mode<synchronous>, transform_indices = @transform_1, window_bounds = array<i64: 32, 1>}, {pipeline_mode = #tpu.pipeline_mode<synchronous>, transform_indices = @transform_2, window_bounds = array<i64: 32, 1>}, {pipeline_mode = #tpu.pipeline_mode<synchronous>, transform_indices = @transform_3, window_bounds = array<i64: 32, 32>}, {pipeline_mode = #tpu.pipeline_mode<synchronous>, transform_indices = @transform_4, window_bounds = array<i64: 32, 1>}, {transform_indices = @transform_5, window_bounds = array<i64: 32, 512>}]} {
    %c0 = arith.constant 0 : index
    %c0_0 = arith.constant 0 : index
    %0 = vector.load %arg2[%c0, %c0_0] : memref<32x1xf32, #tpu.memory_space<vmem>>, vector<32x1xf32>
    %c0_1 = arith.constant 0 : index
    %c0_2 = arith.constant 0 : index
    %1 = vector.load %arg1[%c0_1, %c0_2] : memref<1x512xf32, #tpu.memory_space<vmem>>, vector<1x512xf32>
    %2 = vector.broadcast %0 : vector<32x1xf32> to vector<32x512xf32>
    %3 = vector.broadcast %1 : vector<1x512xf32> to vector<32x512xf32>
    %4 = arith.mulf %2, %3 : vector<32x512xf32>
    %c0_3 = arith.constant 0 : index
    %c0_4 = arith.constant 0 : index
    %5 = vector.load %arg3[%c0_3, %c0_4] : memref<32x1xf32, #tpu.memory_space<vmem>>, vector<32x1xf32>
    %6 = vector.broadcast %5 : vector<32x1xf32> to vector<32x512xf32>
    %7 = arith.addf %4, %6 : vector<32x512xf32>
    %cst = arith.constant 0.000000e+00 : f32
    %8 = vector.broadcast %cst : f32 to vector<32x512xf32>
    %9 = arith.maximumf %7, %8 : vector<32x512xf32>
    %c0_5 = arith.constant 0 : index
    %c0_6 = arith.constant 0 : index
    %10 = vector.load %arg4[%c0_5, %c0_6] : memref<32x32xbf16, #tpu.memory_space<vmem>>, vector<32x32xbf16>
    %11 = arith.truncf %9 : vector<32x512xf32> to vector<32x512xbf16>
    %cst_7 = arith.constant dense<0.000000e+00> : vector<32x512xf32>
    %12 = tpu.matmul %10, %11, %cst_7 {dimension_numbers = #tpu.dot_dimension_numbers<[1], [0], [0], [1], [0, 0, 1, 1], [], []>} : vector<32x32xbf16>, vector<32x512xbf16>, vector<32x512xf32> -> vector<32x512xf32>
    %c0_8 = arith.constant 0 : index
    %c0_9 = arith.constant 0 : index
    %13 = vector.load %arg5[%c0_8, %c0_9] : memref<32x1xf32, #tpu.memory_space<vmem>>, vector<32x1xf32>
    %14 = vector.broadcast %13 : vector<32x1xf32> to vector<32x512xf32>
    %15 = arith.addf %12, %14 : vector<32x512xf32>
    %16 = arith.truncf %15 : vector<32x512xf32> to vector<32x512xbf16>
    %c0_10 = arith.constant 0 : index
    %c0_11 = arith.constant 0 : index
    %17 = vector.load %arg6[%c0_10, %c0_11] : memref<32x512xbf16, #tpu.memory_space<vmem>>, vector<32x512xbf16>
    tpu.vector_store %arg6[%c0_10, %c0_11], %16 {strides = array<i32>} : memref<32x512xbf16, #tpu.memory_space<vmem>>, vector<32x512xbf16>,
    return
  }
  func.func @transform_0(%arg0: i32) -> (i32, i32) {
    %c0_i32 = arith.constant 0 : i32
    %c0_i32_0 = arith.constant 0 : i32
    return %c0_i32, %arg0 : i32, i32
  }
  func.func @transform_1(%arg0: i32) -> (i32, i32) {
    %c0_i32 = arith.constant 0 : i32
    %c0_i32_0 = arith.constant 0 : i32
    %c0_i32_1 = arith.constant 0 : i32
    return %c0_i32, %c0_i32_0 : i32, i32
  }
  func.func @transform_2(%arg0: i32) -> (i32, i32) {
    %c0_i32 = arith.constant 0 : i32
    %c0_i32_0 = arith.constant 0 : i32
    %c0_i32_1 = arith.constant 0 : i32
    return %c0_i32, %c0_i32_0 : i32, i32
  }
  func.func @transform_3(%arg0: i32) -> (i32, i32) {
    %c0_i32 = arith.constant 0 : i32
    %c0_i32_0 = arith.constant 0 : i32
    %c0_i32_1 = arith.constant 0 : i32
    return %c0_i32, %c0_i32_0 : i32, i32
  }
  func.func @transform_4(%arg0: i32) -> (i32, i32) {
    %c0_i32 = arith.constant 0 : i32
    %c0_i32_0 = arith.constant 0 : i32
    %c0_i32_1 = arith.constant 0 : i32
    return %c0_i32, %c0_i32_0 : i32, i32
  }
  func.func @transform_5(%arg0: i32) -> (i32, i32) {
    %c0_i32 = arith.constant 0 : i32
    %c0_i32_0 = arith.constant 0 : i32
    return %c0_i32, %arg0 : i32, i32
  }
}

module attributes {stable_mosaic.version = 11 : i64} {
  func.func @_edge_block0_kernel(%arg0: i32, %arg1: memref<32x512xbf16, #tpu.memory_space<vmem>>, %arg2: memref<32x512xbf16, #tpu.memory_space<vmem>>, %arg3: memref<1x512xf32, #tpu.memory_space<vmem>>, %arg4: memref<32x1xf32, #tpu.memory_space<vmem>>, %arg5: memref<32x1xf32, #tpu.memory_space<vmem>>, %arg6: memref<32x32xbf16, #tpu.memory_space<vmem>>, %arg7: memref<32x1xf32, #tpu.memory_space<vmem>>, %arg8: memref<32x32xbf16, #tpu.memory_space<vmem>>, %arg9: memref<32x32xbf16, #tpu.memory_space<vmem>>, %arg10: memref<32x32xbf16, #tpu.memory_space<vmem>>, %arg11: memref<32x1xf32, #tpu.memory_space<vmem>>, %arg12: memref<32x32xbf16, #tpu.memory_space<vmem>>, %arg13: memref<32x1xf32, #tpu.memory_space<vmem>>, %arg14: memref<32x512xbf16, #tpu.memory_space<vmem>>) attributes {dimension_semantics = [#tpu.dimension_semantics<parallel>], iteration_bounds = array<i64: 1>, scalar_prefetch = 0 : i64, scratch_operands = 0 : i64, tpu.core_type = #tpu.core_type<tc>, window_params = [{transform_indices = @transform_0, window_bounds = array<i64: 32, 512>}, {transform_indices = @transform_1, window_bounds = array<i64: 32, 512>}, {transform_indices = @transform_2, window_bounds = array<i64: 1, 512>}, {pipeline_mode = #tpu.pipeline_mode<synchronous>, transform_indices = @transform_3, window_bounds = array<i64: 32, 1>}, {pipeline_mode = #tpu.pipeline_mode<synchronous>, transform_indices = @transform_4, window_bounds = array<i64: 32, 1>}, {pipeline_mode = #tpu.pipeline_mode<synchronous>, transform_indices = @transform_5, window_bounds = array<i64: 32, 32>}, {pipeline_mode = #tpu.pipeline_mode<synchronous>, transform_indices = @transform_6, window_bounds = array<i64: 32, 1>}, {pipeline_mode = #tpu.pipeline_mode<synchronous>, transform_indices = @transform_7, window_bounds = array<i64: 32, 32>}, {pipeline_mode = #tpu.pipeline_mode<synchronous>, transform_indices = @transform_8, window_bounds = array<i64: 32, 32>}, {pipeline_mode = #tpu.pipeline_mode<synchronous>, transform_indices = @transform_9, window_bounds = array<i64: 32, 32>}, {pipeline_mode = #tpu.pipeline_mode<synchronous>, transform_indices = @transform_10, window_bounds = array<i64: 32, 1>}, {pipeline_mode = #tpu.pipeline_mode<synchronous>, transform_indices = @transform_11, window_bounds = array<i64: 32, 32>}, {pipeline_mode = #tpu.pipeline_mode<synchronous>, transform_indices = @transform_12, window_bounds = array<i64: 32, 1>}, {transform_indices = @transform_13, window_bounds = array<i64: 32, 512>}]} {
    %c0 = arith.constant 0 : index
    %c0_0 = arith.constant 0 : index
    %0 = vector.load %arg4[%c0, %c0_0] : memref<32x1xf32, #tpu.memory_space<vmem>>, vector<32x1xf32>
    %c0_1 = arith.constant 0 : index
    %c0_2 = arith.constant 0 : index
    %1 = vector.load %arg3[%c0_1, %c0_2] : memref<1x512xf32, #tpu.memory_space<vmem>>, vector<1x512xf32>
    %2 = vector.broadcast %0 : vector<32x1xf32> to vector<32x512xf32>
    %3 = vector.broadcast %1 : vector<1x512xf32> to vector<32x512xf32>
    %4 = arith.mulf %2, %3 : vector<32x512xf32>
    %c0_3 = arith.constant 0 : index
    %c0_4 = arith.constant 0 : index
    %5 = vector.load %arg5[%c0_3, %c0_4] : memref<32x1xf32, #tpu.memory_space<vmem>>, vector<32x1xf32>
    %6 = vector.broadcast %5 : vector<32x1xf32> to vector<32x512xf32>
    %7 = arith.addf %4, %6 : vector<32x512xf32>
    %cst = arith.constant 0.000000e+00 : f32
    %8 = vector.broadcast %cst : f32 to vector<32x512xf32>
    %9 = arith.maximumf %7, %8 : vector<32x512xf32>
    %c0_5 = arith.constant 0 : index
    %c0_6 = arith.constant 0 : index
    %10 = vector.load %arg6[%c0_5, %c0_6] : memref<32x32xbf16, #tpu.memory_space<vmem>>, vector<32x32xbf16>
    %11 = arith.truncf %9 : vector<32x512xf32> to vector<32x512xbf16>
    %cst_7 = arith.constant dense<0.000000e+00> : vector<32x512xf32>
    %12 = tpu.matmul %10, %11, %cst_7 {dimension_numbers = #tpu.dot_dimension_numbers<[1], [0], [0], [1], [0, 0, 1, 1], [], []>} : vector<32x32xbf16>, vector<32x512xbf16>, vector<32x512xf32> -> vector<32x512xf32>
    %c0_8 = arith.constant 0 : index
    %c0_9 = arith.constant 0 : index
    %13 = vector.load %arg7[%c0_8, %c0_9] : memref<32x1xf32, #tpu.memory_space<vmem>>, vector<32x1xf32>
    %14 = vector.broadcast %13 : vector<32x1xf32> to vector<32x512xf32>
    %15 = arith.addf %12, %14 : vector<32x512xf32>
    %c0_10 = arith.constant 0 : index
    %c0_11 = arith.constant 0 : index
    %16 = vector.load %arg8[%c0_10, %c0_11] : memref<32x32xbf16, #tpu.memory_space<vmem>>, vector<32x32xbf16>
    %c0_12 = arith.constant 0 : index
    %c0_13 = arith.constant 0 : index
    %17 = vector.load %arg1[%c0_12, %c0_13] : memref<32x512xbf16, #tpu.memory_space<vmem>>, vector<32x512xbf16>
    %cst_14 = arith.constant dense<0.000000e+00> : vector<32x512xf32>
    %18 = tpu.matmul %16, %17, %cst_14 {dimension_numbers = #tpu.dot_dimension_numbers<[1], [0], [0], [1], [0, 0, 1, 1], [], []>} : vector<32x32xbf16>, vector<32x512xbf16>, vector<32x512xf32> -> vector<32x512xf32>
    %c0_15 = arith.constant 0 : index
    %c0_16 = arith.constant 0 : index
    %19 = vector.load %arg9[%c0_15, %c0_16] : memref<32x32xbf16, #tpu.memory_space<vmem>>, vector<32x32xbf16>
    %c0_17 = arith.constant 0 : index
    %c0_18 = arith.constant 0 : index
    %20 = vector.load %arg2[%c0_17, %c0_18] : memref<32x512xbf16, #tpu.memory_space<vmem>>, vector<32x512xbf16>
    %cst_19 = arith.constant dense<0.000000e+00> : vector<32x512xf32>
    %21 = tpu.matmul %19, %20, %cst_19 {dimension_numbers = #tpu.dot_dimension_numbers<[1], [0], [0], [1], [0, 0, 1, 1], [], []>} : vector<32x32xbf16>, vector<32x512xbf16>, vector<32x512xf32> -> vector<32x512xf32>
    %22 = arith.addf %18, %21 : vector<32x512xf32>
    %c0_20 = arith.constant 0 : index
    %c0_21 = arith.constant 0 : index
    %23 = vector.load %arg10[%c0_20, %c0_21] : memref<32x32xbf16, #tpu.memory_space<vmem>>, vector<32x32xbf16>
    %24 = arith.truncf %15 : vector<32x512xf32> to vector<32x512xbf16>
    %cst_22 = arith.constant dense<0.000000e+00> : vector<32x512xf32>
    %25 = tpu.matmul %23, %24, %cst_22 {dimension_numbers = #tpu.dot_dimension_numbers<[1], [0], [0], [1], [0, 0, 1, 1], [], []>} : vector<32x32xbf16>, vector<32x512xbf16>, vector<32x512xf32> -> vector<32x512xf32>
    %26 = arith.addf %22, %25 : vector<32x512xf32>
    %c0_23 = arith.constant 0 : index
    %c0_24 = arith.constant 0 : index
    %27 = vector.load %arg11[%c0_23, %c0_24] : memref<32x1xf32, #tpu.memory_space<vmem>>, vector<32x1xf32>
    %28 = vector.broadcast %27 : vector<32x1xf32> to vector<32x512xf32>
    %29 = arith.addf %26, %28 : vector<32x512xf32>
    %cst_25 = arith.constant 0.000000e+00 : f32
    %30 = vector.broadcast %cst_25 : f32 to vector<32x512xf32>
    %31 = arith.maximumf %29, %30 : vector<32x512xf32>
    %c0_26 = arith.constant 0 : index
    %c0_27 = arith.constant 0 : index
    %32 = vector.load %arg12[%c0_26, %c0_27] : memref<32x32xbf16, #tpu.memory_space<vmem>>, vector<32x32xbf16>
    %33 = arith.truncf %31 : vector<32x512xf32> to vector<32x512xbf16>
    %cst_28 = arith.constant dense<0.000000e+00> : vector<32x512xf32>
    %34 = tpu.matmul %32, %33, %cst_28 {dimension_numbers = #tpu.dot_dimension_numbers<[1], [0], [0], [1], [0, 0, 1, 1], [], []>} : vector<32x32xbf16>, vector<32x512xbf16>, vector<32x512xf32> -> vector<32x512xf32>
    %c0_29 = arith.constant 0 : index
    %c0_30 = arith.constant 0 : index
    %35 = vector.load %arg13[%c0_29, %c0_30] : memref<32x1xf32, #tpu.memory_space<vmem>>, vector<32x1xf32>
    %36 = vector.broadcast %35 : vector<32x1xf32> to vector<32x512xf32>
    %37 = arith.addf %34, %36 : vector<32x512xf32>
    %38 = arith.truncf %37 : vector<32x512xf32> to vector<32x512xbf16>
    %c0_31 = arith.constant 0 : index
    %c0_32 = arith.constant 0 : index
    %39 = vector.load %arg14[%c0_31, %c0_32] : memref<32x512xbf16, #tpu.memory_space<vmem>>, vector<32x512xbf16>
    tpu.vector_store %arg14[%c0_31, %c0_32], %38 {strides = array<i32>} : memref<32x512xbf16, #tpu.memory_space<vmem>>, vector<32x512xbf16>,
    return
  }
  func.func @transform_0(%arg0: i32) -> (i32, i32) {
    %c0_i32 = arith.constant 0 : i32
    %c0_i32_0 = arith.constant 0 : i32
    return %c0_i32, %arg0 : i32, i32
  }
  func.func @transform_1(%arg0: i32) -> (i32, i32) {
    %c0_i32 = arith.constant 0 : i32
    %c0_i32_0 = arith.constant 0 : i32
    return %c0_i32, %arg0 : i32, i32
  }
  func.func @transform_2(%arg0: i32) -> (i32, i32) {
    %c0_i32 = arith.constant 0 : i32
    %c0_i32_0 = arith.constant 0 : i32
    return %c0_i32, %arg0 : i32, i32
  }
  func.func @transform_3(%arg0: i32) -> (i32, i32) {
    %c0_i32 = arith.constant 0 : i32
    %c0_i32_0 = arith.constant 0 : i32
    %c0_i32_1 = arith.constant 0 : i32
    return %c0_i32, %c0_i32_0 : i32, i32
  }
  func.func @transform_4(%arg0: i32) -> (i32, i32) {
    %c0_i32 = arith.constant 0 : i32
    %c0_i32_0 = arith.constant 0 : i32
    %c0_i32_1 = arith.constant 0 : i32
    return %c0_i32, %c0_i32_0 : i32, i32
  }
  func.func @transform_5(%arg0: i32) -> (i32, i32) {
    %c0_i32 = arith.constant 0 : i32
    %c0_i32_0 = arith.constant 0 : i32
    %c0_i32_1 = arith.constant 0 : i32
    return %c0_i32, %c0_i32_0 : i32, i32
  }
  func.func @transform_6(%arg0: i32) -> (i32, i32) {
    %c0_i32 = arith.constant 0 : i32
    %c0_i32_0 = arith.constant 0 : i32
    %c0_i32_1 = arith.constant 0 : i32
    return %c0_i32, %c0_i32_0 : i32, i32
  }
  func.func @transform_7(%arg0: i32) -> (i32, i32) {
    %c0_i32 = arith.constant 0 : i32
    %c0_i32_0 = arith.constant 0 : i32
    %c0_i32_1 = arith.constant 0 : i32
    return %c0_i32, %c0_i32_0 : i32, i32
  }
  func.func @transform_8(%arg0: i32) -> (i32, i32) {
    %c0_i32 = arith.constant 0 : i32
    %c0_i32_0 = arith.constant 0 : i32
    %c0_i32_1 = arith.constant 0 : i32
    return %c0_i32, %c0_i32_0 : i32, i32
  }
  func.func @transform_9(%arg0: i32) -> (i32, i32) {
    %c0_i32 = arith.constant 0 : i32
    %c0_i32_0 = arith.constant 0 : i32
    %c0_i32_1 = arith.constant 0 : i32
    return %c0_i32, %c0_i32_0 : i32, i32
  }
  func.func @transform_10(%arg0: i32) -> (i32, i32) {
    %c0_i32 = arith.constant 0 : i32
    %c0_i32_0 = arith.constant 0 : i32
    %c0_i32_1 = arith.constant 0 : i32
    return %c0_i32, %c0_i32_0 : i32, i32
  }
  func.func @transform_11(%arg0: i32) -> (i32, i32) {
    %c0_i32 = arith.constant 0 : i32
    %c0_i32_0 = arith.constant 0 : i32
    %c0_i32_1 = arith.constant 0 : i32
    return %c0_i32, %c0_i32_0 : i32, i32
  }
  func.func @transform_12(%arg0: i32) -> (i32, i32) {
    %c0_i32 = arith.constant 0 : i32
    %c0_i32_0 = arith.constant 0 : i32
    %c0_i32_1 = arith.constant 0 : i32
    return %c0_i32, %c0_i32_0 : i32, i32
  }
  func.func @transform_13(%arg0: i32) -> (i32, i32) {
    %c0_i32 = arith.constant 0 : i32
    %c0_i32_0 = arith.constant 0 : i32
    return %c0_i32, %arg0 : i32, i32
  }
}

module attributes {stable_mosaic.version = 11 : i64} {
  func.func @_node_block_kernel(%arg0: i32, %arg1: memref<32x512xbf16, #tpu.memory_space<vmem>>, %arg2: memref<32x512xbf16, #tpu.memory_space<vmem>>, %arg3: memref<1x512xf32, #tpu.memory_space<vmem>>, %arg4: memref<32x32xbf16, #tpu.memory_space<vmem>>, %arg5: memref<32x32xbf16, #tpu.memory_space<vmem>>, %arg6: memref<32x1xf32, #tpu.memory_space<vmem>>, %arg7: memref<32x32xbf16, #tpu.memory_space<vmem>>, %arg8: memref<32x1xf32, #tpu.memory_space<vmem>>, %arg9: memref<32x512xbf16, #tpu.memory_space<vmem>>) attributes {dimension_semantics = [#tpu.dimension_semantics<parallel>], iteration_bounds = array<i64: 1>, scalar_prefetch = 0 : i64, scratch_operands = 0 : i64, tpu.core_type = #tpu.core_type<tc>, window_params = [{transform_indices = @transform_0, window_bounds = array<i64: 32, 512>}, {transform_indices = @transform_1, window_bounds = array<i64: 32, 512>}, {transform_indices = @transform_2, window_bounds = array<i64: 1, 512>}, {pipeline_mode = #tpu.pipeline_mode<synchronous>, transform_indices = @transform_3, window_bounds = array<i64: 32, 32>}, {pipeline_mode = #tpu.pipeline_mode<synchronous>, transform_indices = @transform_4, window_bounds = array<i64: 32, 32>}, {pipeline_mode = #tpu.pipeline_mode<synchronous>, transform_indices = @transform_5, window_bounds = array<i64: 32, 1>}, {pipeline_mode = #tpu.pipeline_mode<synchronous>, transform_indices = @transform_6, window_bounds = array<i64: 32, 32>}, {pipeline_mode = #tpu.pipeline_mode<synchronous>, transform_indices = @transform_7, window_bounds = array<i64: 32, 1>}, {transform_indices = @transform_8, window_bounds = array<i64: 32, 512>}]} {
    %c0 = arith.constant 0 : index
    %c0_0 = arith.constant 0 : index
    %0 = vector.load %arg4[%c0, %c0_0] : memref<32x32xbf16, #tpu.memory_space<vmem>>, vector<32x32xbf16>
    %c0_1 = arith.constant 0 : index
    %c0_2 = arith.constant 0 : index
    %1 = vector.load %arg1[%c0_1, %c0_2] : memref<32x512xbf16, #tpu.memory_space<vmem>>, vector<32x512xbf16>
    %cst = arith.constant dense<0.000000e+00> : vector<32x512xf32>
    %2 = tpu.matmul %0, %1, %cst {dimension_numbers = #tpu.dot_dimension_numbers<[1], [0], [0], [1], [0, 0, 1, 1], [], []>} : vector<32x32xbf16>, vector<32x512xbf16>, vector<32x512xf32> -> vector<32x512xf32>
    %c0_3 = arith.constant 0 : index
    %c0_4 = arith.constant 0 : index
    %3 = vector.load %arg5[%c0_3, %c0_4] : memref<32x32xbf16, #tpu.memory_space<vmem>>, vector<32x32xbf16>
    %c0_5 = arith.constant 0 : index
    %c0_6 = arith.constant 0 : index
    %4 = vector.load %arg2[%c0_5, %c0_6] : memref<32x512xbf16, #tpu.memory_space<vmem>>, vector<32x512xbf16>
    %cst_7 = arith.constant dense<0.000000e+00> : vector<32x512xf32>
    %5 = tpu.matmul %3, %4, %cst_7 {dimension_numbers = #tpu.dot_dimension_numbers<[1], [0], [0], [1], [0, 0, 1, 1], [], []>} : vector<32x32xbf16>, vector<32x512xbf16>, vector<32x512xf32> -> vector<32x512xf32>
    %c0_8 = arith.constant 0 : index
    %c0_9 = arith.constant 0 : index
    %6 = vector.load %arg3[%c0_8, %c0_9] : memref<1x512xf32, #tpu.memory_space<vmem>>, vector<1x512xf32>
    %7 = vector.broadcast %6 : vector<1x512xf32> to vector<32x512xf32>
    %8 = arith.mulf %5, %7 : vector<32x512xf32>
    %9 = arith.addf %2, %8 : vector<32x512xf32>
    %c0_10 = arith.constant 0 : index
    %c0_11 = arith.constant 0 : index
    %10 = vector.load %arg6[%c0_10, %c0_11] : memref<32x1xf32, #tpu.memory_space<vmem>>, vector<32x1xf32>
    %11 = vector.broadcast %10 : vector<32x1xf32> to vector<32x512xf32>
    %12 = arith.addf %9, %11 : vector<32x512xf32>
    %cst_12 = arith.constant 0.000000e+00 : f32
    %13 = vector.broadcast %cst_12 : f32 to vector<32x512xf32>
    %14 = arith.maximumf %12, %13 : vector<32x512xf32>
    %c0_13 = arith.constant 0 : index
    %c0_14 = arith.constant 0 : index
    %15 = vector.load %arg7[%c0_13, %c0_14] : memref<32x32xbf16, #tpu.memory_space<vmem>>, vector<32x32xbf16>
    %16 = arith.truncf %14 : vector<32x512xf32> to vector<32x512xbf16>
    %cst_15 = arith.constant dense<0.000000e+00> : vector<32x512xf32>
    %17 = tpu.matmul %15, %16, %cst_15 {dimension_numbers = #tpu.dot_dimension_numbers<[1], [0], [0], [1], [0, 0, 1, 1], [], []>} : vector<32x32xbf16>, vector<32x512xbf16>, vector<32x512xf32> -> vector<32x512xf32>
    %c0_16 = arith.constant 0 : index
    %c0_17 = arith.constant 0 : index
    %18 = vector.load %arg8[%c0_16, %c0_17] : memref<32x1xf32, #tpu.memory_space<vmem>>, vector<32x1xf32>
    %19 = vector.broadcast %18 : vector<32x1xf32> to vector<32x512xf32>
    %20 = arith.addf %17, %19 : vector<32x512xf32>
    %21 = arith.truncf %20 : vector<32x512xf32> to vector<32x512xbf16>
    %c0_18 = arith.constant 0 : index
    %c0_19 = arith.constant 0 : index
    %22 = vector.load %arg9[%c0_18, %c0_19] : memref<32x512xbf16, #tpu.memory_space<vmem>>, vector<32x512xbf16>
    tpu.vector_store %arg9[%c0_18, %c0_19], %21 {strides = array<i32>} : memref<32x512xbf16, #tpu.memory_space<vmem>>, vector<32x512xbf16>,
    return
  }
  func.func @transform_0(%arg0: i32) -> (i32, i32) {
    %c0_i32 = arith.constant 0 : i32
    %c0_i32_0 = arith.constant 0 : i32
    return %c0_i32, %arg0 : i32, i32
  }
  func.func @transform_1(%arg0: i32) -> (i32, i32) {
    %c0_i32 = arith.constant 0 : i32
    %c0_i32_0 = arith.constant 0 : i32
    return %c0_i32, %arg0 : i32, i32
  }
  func.func @transform_2(%arg0: i32) -> (i32, i32) {
    %c0_i32 = arith.constant 0 : i32
    %c0_i32_0 = arith.constant 0 : i32
    return %c0_i32, %arg0 : i32, i32
  }
  func.func @transform_3(%arg0: i32) -> (i32, i32) {
    %c0_i32 = arith.constant 0 : i32
    %c0_i32_0 = arith.constant 0 : i32
    %c0_i32_1 = arith.constant 0 : i32
    return %c0_i32, %c0_i32_0 : i32, i32
  }
  func.func @transform_4(%arg0: i32) -> (i32, i32) {
    %c0_i32 = arith.constant 0 : i32
    %c0_i32_0 = arith.constant 0 : i32
    %c0_i32_1 = arith.constant 0 : i32
    return %c0_i32, %c0_i32_0 : i32, i32
  }
  func.func @transform_5(%arg0: i32) -> (i32, i32) {
    %c0_i32 = arith.constant 0 : i32
    %c0_i32_0 = arith.constant 0 : i32
    %c0_i32_1 = arith.constant 0 : i32
    return %c0_i32, %c0_i32_0 : i32, i32
  }
  func.func @transform_6(%arg0: i32) -> (i32, i32) {
    %c0_i32 = arith.constant 0 : i32
    %c0_i32_0 = arith.constant 0 : i32
    %c0_i32_1 = arith.constant 0 : i32
    return %c0_i32, %c0_i32_0 : i32, i32
  }
  func.func @transform_7(%arg0: i32) -> (i32, i32) {
    %c0_i32 = arith.constant 0 : i32
    %c0_i32_0 = arith.constant 0 : i32
    %c0_i32_1 = arith.constant 0 : i32
    return %c0_i32, %c0_i32_0 : i32, i32
  }
  func.func @transform_8(%arg0: i32) -> (i32, i32) {
    %c0_i32 = arith.constant 0 : i32
    %c0_i32_0 = arith.constant 0 : i32
    return %c0_i32, %arg0 : i32, i32
  }
}

module attributes {stable_mosaic.version = 11 : i64} {
  func.func @_edge_block_kernel(%arg0: i32, %arg1: memref<32x512xbf16, #tpu.memory_space<vmem>>, %arg2: memref<32x512xbf16, #tpu.memory_space<vmem>>, %arg3: memref<32x512xbf16, #tpu.memory_space<vmem>>, %arg4: memref<32x32xbf16, #tpu.memory_space<vmem>>, %arg5: memref<32x32xbf16, #tpu.memory_space<vmem>>, %arg6: memref<32x32xbf16, #tpu.memory_space<vmem>>, %arg7: memref<32x1xf32, #tpu.memory_space<vmem>>, %arg8: memref<32x32xbf16, #tpu.memory_space<vmem>>, %arg9: memref<32x1xf32, #tpu.memory_space<vmem>>, %arg10: memref<32x512xbf16, #tpu.memory_space<vmem>>) attributes {dimension_semantics = [#tpu.dimension_semantics<parallel>], iteration_bounds = array<i64: 1>, scalar_prefetch = 0 : i64, scratch_operands = 0 : i64, tpu.core_type = #tpu.core_type<tc>, window_params = [{transform_indices = @transform_0, window_bounds = array<i64: 32, 512>}, {transform_indices = @transform_1, window_bounds = array<i64: 32, 512>}, {transform_indices = @transform_2, window_bounds = array<i64: 32, 512>}, {pipeline_mode = #tpu.pipeline_mode<synchronous>, transform_indices = @transform_3, window_bounds = array<i64: 32, 32>}, {pipeline_mode = #tpu.pipeline_mode<synchronous>, transform_indices = @transform_4, window_bounds = array<i64: 32, 32>}, {pipeline_mode = #tpu.pipeline_mode<synchronous>, transform_indices = @transform_5, window_bounds = array<i64: 32, 32>}, {pipeline_mode = #tpu.pipeline_mode<synchronous>, transform_indices = @transform_6, window_bounds = array<i64: 32, 1>}, {pipeline_mode = #tpu.pipeline_mode<synchronous>, transform_indices = @transform_7, window_bounds = array<i64: 32, 32>}, {pipeline_mode = #tpu.pipeline_mode<synchronous>, transform_indices = @transform_8, window_bounds = array<i64: 32, 1>}, {transform_indices = @transform_9, window_bounds = array<i64: 32, 512>}]} {
    %c0 = arith.constant 0 : index
    %c0_0 = arith.constant 0 : index
    %0 = vector.load %arg4[%c0, %c0_0] : memref<32x32xbf16, #tpu.memory_space<vmem>>, vector<32x32xbf16>
    %c0_1 = arith.constant 0 : index
    %c0_2 = arith.constant 0 : index
    %1 = vector.load %arg1[%c0_1, %c0_2] : memref<32x512xbf16, #tpu.memory_space<vmem>>, vector<32x512xbf16>
    %cst = arith.constant dense<0.000000e+00> : vector<32x512xf32>
    %2 = tpu.matmul %0, %1, %cst {dimension_numbers = #tpu.dot_dimension_numbers<[1], [0], [0], [1], [0, 0, 1, 1], [], []>} : vector<32x32xbf16>, vector<32x512xbf16>, vector<32x512xf32> -> vector<32x512xf32>
    %c0_3 = arith.constant 0 : index
    %c0_4 = arith.constant 0 : index
    %3 = vector.load %arg5[%c0_3, %c0_4] : memref<32x32xbf16, #tpu.memory_space<vmem>>, vector<32x32xbf16>
    %c0_5 = arith.constant 0 : index
    %c0_6 = arith.constant 0 : index
    %4 = vector.load %arg2[%c0_5, %c0_6] : memref<32x512xbf16, #tpu.memory_space<vmem>>, vector<32x512xbf16>
    %cst_7 = arith.constant dense<0.000000e+00> : vector<32x512xf32>
    %5 = tpu.matmul %3, %4, %cst_7 {dimension_numbers = #tpu.dot_dimension_numbers<[1], [0], [0], [1], [0, 0, 1, 1], [], []>} : vector<32x32xbf16>, vector<32x512xbf16>, vector<32x512xf32> -> vector<32x512xf32>
    %6 = arith.addf %2, %5 : vector<32x512xf32>
    %c0_8 = arith.constant 0 : index
    %c0_9 = arith.constant 0 : index
    %7 = vector.load %arg6[%c0_8, %c0_9] : memref<32x32xbf16, #tpu.memory_space<vmem>>, vector<32x32xbf16>
    %c0_10 = arith.constant 0 : index
    %c0_11 = arith.constant 0 : index
    %8 = vector.load %arg3[%c0_10, %c0_11] : memref<32x512xbf16, #tpu.memory_space<vmem>>, vector<32x512xbf16>
    %cst_12 = arith.constant dense<0.000000e+00> : vector<32x512xf32>
    %9 = tpu.matmul %7, %8, %cst_12 {dimension_numbers = #tpu.dot_dimension_numbers<[1], [0], [0], [1], [0, 0, 1, 1], [], []>} : vector<32x32xbf16>, vector<32x512xbf16>, vector<32x512xf32> -> vector<32x512xf32>
    %10 = arith.addf %6, %9 : vector<32x512xf32>
    %c0_13 = arith.constant 0 : index
    %c0_14 = arith.constant 0 : index
    %11 = vector.load %arg7[%c0_13, %c0_14] : memref<32x1xf32, #tpu.memory_space<vmem>>, vector<32x1xf32>
    %12 = vector.broadcast %11 : vector<32x1xf32> to vector<32x512xf32>
    %13 = arith.addf %10, %12 : vector<32x512xf32>
    %cst_15 = arith.constant 0.000000e+00 : f32
    %14 = vector.broadcast %cst_15 : f32 to vector<32x512xf32>
    %15 = arith.maximumf %13, %14 : vector<32x512xf32>
    %c0_16 = arith.constant 0 : index
    %c0_17 = arith.constant 0 : index
    %16 = vector.load %arg8[%c0_16, %c0_17] : memref<32x32xbf16, #tpu.memory_space<vmem>>, vector<32x32xbf16>
    %17 = arith.truncf %15 : vector<32x512xf32> to vector<32x512xbf16>
    %cst_18 = arith.constant dense<0.000000e+00> : vector<32x512xf32>
    %18 = tpu.matmul %16, %17, %cst_18 {dimension_numbers = #tpu.dot_dimension_numbers<[1], [0], [0], [1], [0, 0, 1, 1], [], []>} : vector<32x32xbf16>, vector<32x512xbf16>, vector<32x512xf32> -> vector<32x512xf32>
    %c0_19 = arith.constant 0 : index
    %c0_20 = arith.constant 0 : index
    %19 = vector.load %arg9[%c0_19, %c0_20] : memref<32x1xf32, #tpu.memory_space<vmem>>, vector<32x1xf32>
    %20 = vector.broadcast %19 : vector<32x1xf32> to vector<32x512xf32>
    %21 = arith.addf %18, %20 : vector<32x512xf32>
    %22 = arith.truncf %21 : vector<32x512xf32> to vector<32x512xbf16>
    %c0_21 = arith.constant 0 : index
    %c0_22 = arith.constant 0 : index
    %23 = vector.load %arg10[%c0_21, %c0_22] : memref<32x512xbf16, #tpu.memory_space<vmem>>, vector<32x512xbf16>
    tpu.vector_store %arg10[%c0_21, %c0_22], %22 {strides = array<i32>} : memref<32x512xbf16, #tpu.memory_space<vmem>>, vector<32x512xbf16>,
    return
  }
  func.func @transform_0(%arg0: i32) -> (i32, i32) {
    %c0_i32 = arith.constant 0 : i32
    %c0_i32_0 = arith.constant 0 : i32
    return %c0_i32, %arg0 : i32, i32
  }
  func.func @transform_1(%arg0: i32) -> (i32, i32) {
    %c0_i32 = arith.constant 0 : i32
    %c0_i32_0 = arith.constant 0 : i32
    return %c0_i32, %arg0 : i32, i32
  }
  func.func @transform_2(%arg0: i32) -> (i32, i32) {
    %c0_i32 = arith.constant 0 : i32
    %c0_i32_0 = arith.constant 0 : i32
    return %c0_i32, %arg0 : i32, i32
  }
  func.func @transform_3(%arg0: i32) -> (i32, i32) {
    %c0_i32 = arith.constant 0 : i32
    %c0_i32_0 = arith.constant 0 : i32
    %c0_i32_1 = arith.constant 0 : i32
    return %c0_i32, %c0_i32_0 : i32, i32
  }
  func.func @transform_4(%arg0: i32) -> (i32, i32) {
    %c0_i32 = arith.constant 0 : i32
    %c0_i32_0 = arith.constant 0 : i32
    %c0_i32_1 = arith.constant 0 : i32
    return %c0_i32, %c0_i32_0 : i32, i32
  }
  func.func @transform_5(%arg0: i32) -> (i32, i32) {
    %c0_i32 = arith.constant 0 : i32
    %c0_i32_0 = arith.constant 0 : i32
    %c0_i32_1 = arith.constant 0 : i32
    return %c0_i32, %c0_i32_0 : i32, i32
  }
  func.func @transform_6(%arg0: i32) -> (i32, i32) {
    %c0_i32 = arith.constant 0 : i32
    %c0_i32_0 = arith.constant 0 : i32
    %c0_i32_1 = arith.constant 0 : i32
    return %c0_i32, %c0_i32_0 : i32, i32
  }
  func.func @transform_7(%arg0: i32) -> (i32, i32) {
    %c0_i32 = arith.constant 0 : i32
    %c0_i32_0 = arith.constant 0 : i32
    %c0_i32_1 = arith.constant 0 : i32
    return %c0_i32, %c0_i32_0 : i32, i32
  }
  func.func @transform_8(%arg0: i32) -> (i32, i32) {
    %c0_i32 = arith.constant 0 : i32
    %c0_i32_0 = arith.constant 0 : i32
    %c0_i32_1 = arith.constant 0 : i32
    return %c0_i32, %c0_i32_0 : i32, i32
  }
  func.func @transform_9(%arg0: i32) -> (i32, i32) {
    %c0_i32 = arith.constant 0 : i32
    %c0_i32_0 = arith.constant 0 : i32
    return %c0_i32, %arg0 : i32, i32
  }
}

module attributes {stable_mosaic.version = 11 : i64} {
  func.func @_decoder_kernel(%arg0: i32, %arg1: memref<32x512xbf16, #tpu.memory_space<vmem>>, %arg2: memref<1x512xf32, #tpu.memory_space<vmem>>, %arg3: memref<1x512xf32, #tpu.memory_space<vmem>>, %arg4: memref<32x32xbf16, #tpu.memory_space<vmem>>, %arg5: memref<32x1xf32, #tpu.memory_space<vmem>>, %arg6: memref<32x1xf32, #tpu.memory_space<vmem>>, %arg7: memref<1x1xf32, #tpu.memory_space<vmem>>, %arg8: memref<1x512xf32, #tpu.memory_space<vmem>>) attributes {dimension_semantics = [#tpu.dimension_semantics<parallel>], iteration_bounds = array<i64: 1>, scalar_prefetch = 0 : i64, scratch_operands = 0 : i64, tpu.core_type = #tpu.core_type<tc>, window_params = [{transform_indices = @transform_0, window_bounds = array<i64: 32, 512>}, {transform_indices = @transform_1, window_bounds = array<i64: 1, 512>}, {transform_indices = @transform_2, window_bounds = array<i64: 1, 512>}, {pipeline_mode = #tpu.pipeline_mode<synchronous>, transform_indices = @transform_3, window_bounds = array<i64: 32, 32>}, {pipeline_mode = #tpu.pipeline_mode<synchronous>, transform_indices = @transform_4, window_bounds = array<i64: 32, 1>}, {pipeline_mode = #tpu.pipeline_mode<synchronous>, transform_indices = @transform_5, window_bounds = array<i64: 32, 1>}, {pipeline_mode = #tpu.pipeline_mode<synchronous>, transform_indices = @transform_6, window_bounds = array<i64: 1, 1>}, {transform_indices = @transform_7, window_bounds = array<i64: 1, 512>}]} {
    %c0 = arith.constant 0 : index
    %c0_0 = arith.constant 0 : index
    %0 = vector.load %arg4[%c0, %c0_0] : memref<32x32xbf16, #tpu.memory_space<vmem>>, vector<32x32xbf16>
    %c0_1 = arith.constant 0 : index
    %c0_2 = arith.constant 0 : index
    %1 = vector.load %arg1[%c0_1, %c0_2] : memref<32x512xbf16, #tpu.memory_space<vmem>>, vector<32x512xbf16>
    %cst = arith.constant dense<0.000000e+00> : vector<32x512xf32>
    %2 = tpu.matmul %0, %1, %cst {dimension_numbers = #tpu.dot_dimension_numbers<[1], [0], [0], [1], [0, 0, 1, 1], [], []>} : vector<32x32xbf16>, vector<32x512xbf16>, vector<32x512xf32> -> vector<32x512xf32>
    %c0_3 = arith.constant 0 : index
    %c0_4 = arith.constant 0 : index
    %3 = vector.load %arg5[%c0_3, %c0_4] : memref<32x1xf32, #tpu.memory_space<vmem>>, vector<32x1xf32>
    %4 = vector.broadcast %3 : vector<32x1xf32> to vector<32x512xf32>
    %5 = arith.addf %2, %4 : vector<32x512xf32>
    %cst_5 = arith.constant 0.000000e+00 : f32
    %6 = vector.broadcast %cst_5 : f32 to vector<32x512xf32>
    %7 = arith.maximumf %5, %6 : vector<32x512xf32>
    %c0_6 = arith.constant 0 : index
    %c0_7 = arith.constant 0 : index
    %8 = vector.load %arg6[%c0_6, %c0_7] : memref<32x1xf32, #tpu.memory_space<vmem>>, vector<32x1xf32>
    %9 = vector.broadcast %8 : vector<32x1xf32> to vector<32x512xf32>
    %10 = arith.mulf %9, %7 : vector<32x512xf32>
    %cst_8 = arith.constant dense<0.000000e+00> : vector<512xf32>
    %11 = vector.multi_reduction <add>, %10, %cst_8 [0] : vector<32x512xf32> to vector<512xf32>
    %12 = vector.shape_cast %11 : vector<512xf32> to vector<1x512xf32>
    %c0_9 = arith.constant 0 : index
    %c0_10 = arith.constant 0 : index
    %13 = vector.load %arg7[%c0_9, %c0_10] : memref<1x1xf32, #tpu.memory_space<vmem>>, vector<1x1xf32>
    %14 = vector.broadcast %13 : vector<1x1xf32> to vector<1x512xf32>
    %15 = arith.addf %12, %14 : vector<1x512xf32>
    %c0_11 = arith.constant 0 : index
    %c0_12 = arith.constant 0 : index
    %16 = vector.load %arg2[%c0_11, %c0_12] : memref<1x512xf32, #tpu.memory_space<vmem>>, vector<1x512xf32>
    %cst_13 = arith.constant 5.000000e-01 : f32
    %17 = vector.broadcast %cst_13 : f32 to vector<1x512xf32>
    %18 = arith.cmpf ogt, %16, %17 : vector<1x512xf32>
    %c0_14 = arith.constant 0 : index
    %c0_15 = arith.constant 0 : index
    %19 = vector.load %arg3[%c0_14, %c0_15] : memref<1x512xf32, #tpu.memory_space<vmem>>, vector<1x512xf32>
    %cst_16 = arith.constant 1.000000e+00 : f32
    %20 = vector.broadcast %cst_16 : f32 to vector<1x512xf32>
    %21 = arith.select %18, %19, %20 : vector<1x512xi1>, vector<1x512xf32>
    %22 = math.sqrt %21 : vector<1x512xf32>
    %cst_17 = arith.constant 5.000000e-01 : f32
    %23 = vector.broadcast %cst_17 : f32 to vector<1x512xf32>
    %24 = arith.mulf %23, %22 : vector<1x512xf32>
    %25 = arith.select %18, %24, %15 : vector<1x512xi1>, vector<1x512xf32>
    %c0_18 = arith.constant 0 : index
    %c0_19 = arith.constant 0 : index
    %26 = vector.load %arg8[%c0_18, %c0_19] : memref<1x512xf32, #tpu.memory_space<vmem>>, vector<1x512xf32>
    tpu.vector_store %arg8[%c0_18, %c0_19], %25 {strides = array<i32>} : memref<1x512xf32, #tpu.memory_space<vmem>>, vector<1x512xf32>,
    return
  }
  func.func @transform_0(%arg0: i32) -> (i32, i32) {
    %c0_i32 = arith.constant 0 : i32
    %c0_i32_0 = arith.constant 0 : i32
    return %c0_i32, %arg0 : i32, i32
  }
  func.func @transform_1(%arg0: i32) -> (i32, i32) {
    %c0_i32 = arith.constant 0 : i32
    %c0_i32_0 = arith.constant 0 : i32
    return %c0_i32, %arg0 : i32, i32
  }
  func.func @transform_2(%arg0: i32) -> (i32, i32) {
    %c0_i32 = arith.constant 0 : i32
    %c0_i32_0 = arith.constant 0 : i32
    return %c0_i32, %arg0 : i32, i32
  }
  func.func @transform_3(%arg0: i32) -> (i32, i32) {
    %c0_i32 = arith.constant 0 : i32
    %c0_i32_0 = arith.constant 0 : i32
    %c0_i32_1 = arith.constant 0 : i32
    return %c0_i32, %c0_i32_0 : i32, i32
  }
  func.func @transform_4(%arg0: i32) -> (i32, i32) {
    %c0_i32 = arith.constant 0 : i32
    %c0_i32_0 = arith.constant 0 : i32
    %c0_i32_1 = arith.constant 0 : i32
    return %c0_i32, %c0_i32_0 : i32, i32
  }
  func.func @transform_5(%arg0: i32) -> (i32, i32) {
    %c0_i32 = arith.constant 0 : i32
    %c0_i32_0 = arith.constant 0 : i32
    %c0_i32_1 = arith.constant 0 : i32
    return %c0_i32, %c0_i32_0 : i32, i32
  }
  func.func @transform_6(%arg0: i32) -> (i32, i32) {
    %c0_i32 = arith.constant 0 : i32
    %c0_i32_0 = arith.constant 0 : i32
    %c0_i32_1 = arith.constant 0 : i32
    return %c0_i32, %c0_i32_0 : i32, i32
  }
  func.func @transform_7(%arg0: i32) -> (i32, i32) {
    %c0_i32 = arith.constant 0 : i32
    %c0_i32_0 = arith.constant 0 : i32
    return %c0_i32, %arg0 : i32, i32
  }
}

</mosaic_0001>

<bundles_post_ra>
// kernel: neuralpcg_forward.5
= control target key start
LH: loop header
LB: loop body
LE: loop exit
PB: predicated region body
PF: predicated region fallthrough
CT: control target
= control target key end

     0   :  { %v385_v0 = vmov 0   ;;  %v47_v13 = vlaneseq  ;;  %vm185_vm0 = vcmask 261120   ;;  %s491_s2 = inlined_call_operand.vmem [shape: f32[32,1], index: 2, kind: input, shape index: {}]   ;;  %s492_s1 = inlined_call_operand.vmem [shape: f32[32,1], index: 1, kind: input, shape index: {}]   ;;  %s493_s4 = inlined_call_operand.vmem [shape: f32[32,1], index: 4, kind: input, shape index: {}]   ;;  %s494_s3 = inlined_call_operand.vmem [shape: bf16[32,32], index: 3, kind: input, shape index: {}]   ;;  %s495_s0 = inlined_call_operand.vmem [shape: f32[1,512], index: 0, kind: input, shape index: {}]   ;;  %s496_s5 = inlined_call_operand.vmem [shape: bf16[32,512], index: 5, kind: output, shape index: {}]  }
   0x1   :  { %382 = vset.pattern.permute.xlu1 %v385_v0  ;;  %381 = vset.pattern.permute.xlu0 %v385_v0  ;;  %v85_v1 = vld [vmem:[%s491_s2 + $0x10] sm:$0xff]  ;;  %v86_v3 = vld [vmem:[%s491_s2 + $0x18] sm:$0xff]  ;;  %v22_v5 = vld [vmem:[%s492_s1 + $0x8] sm:$0xff] }
   0x2   :  { %v23_v2 = vld [vmem:[%s492_s1 + $0x10] sm:$0xff]  ;;  %99 = vperm.xlu1 %382, %v85_v1   ;;  %v24_v4 = vld [vmem:[%s492_s1 + $0x18] sm:$0xff]  ;;  %224 = vmatprep.mubr.bf16.mxu0 %v385_v0  ;;  %v21_v6 = vld [vmem:[%s492_s1] sm:$0xff]  ;;  %v48_v14 = vshrl.u32 %v47_v13, 7 }
   0x3   :  { %38 = vperm.xlu0 %381, %v23_v2   ;;  %277 = vmatprep.mubr.bf16.mxu1 %v385_v0  ;;  %v84_v7 = vld [vmem:[%s491_s2 + $0x8] sm:$0xff]  ;;  %v83_v8 = vld [vmem:[%s491_s2] sm:$0xff]  ;;  %v154_v11 = vld [vmem:[%s493_s4 + $0x18] sm:$0xff] }
   0x4   :  { %v152_v9 = vld [vmem:[%s493_s4 + $0x8] sm:$0xff]  ;;  %v151_v10 = vld [vmem:[%s493_s4] sm:$0xff]  ;;  %v153_v12 = vld [vmem:[%s493_s4 + $0x10] sm:$0xff]  ;;  %v49_v15 = vsub.s32 0, %v48_v14  ;;  %v57_v16 = vsub.s32 2, %v48_v14  ;;  %v53_v17 = vsub.s32 1, %v48_v14 }
   0x5   :  { %v61_v18 = vsub.s32 3, %v48_v14  ;;  %v25_v19 = vld [vmem:[%s495_s0] sm:$0xf] }
   0x6   :  { %104 = vperm.xlu1 %382, %v86_v3   ;;  %v50_v20 = vrot.slane %v25_v19, %v49_v15  ;;  %v58_v21 = vrot.slane %v25_v19, %v57_v16  ;;  %v54_v22 = vrot.slane %v25_v19, %v53_v17 }
   0x7   :  { %43 = vperm.xlu0 %381, %v24_v4   ;;  %v62_v23 = vrot.slane %v25_v19, %v61_v18 }
   0xa   :  { %33 = vperm.xlu1 %382, %v22_v5  }
   0xb   :  { %28 = vperm.xlu0 %381, %v21_v6  }
   0xe   :  { %94 = vperm.xlu1 %382, %v84_v7  }
   0xf   :  { %89 = vperm.xlu0 %381, %v83_v8  }
  0x12   :  { %162 = vperm.xlu1 %382, %v152_v9  }
  0x13   :  { %157 = vperm.xlu0 %381, %v151_v10  }
  0x16   :  { %172 = vperm.xlu1 %382, %v154_v11  }
  0x17   :  { %167 = vperm.xlu0 %381, %v153_v12  }
  0x7d   :  { %v100_v24 = vpop.permute.xlu1 %99 }
  0x7e   :  { %v39_v25 = vpop.permute.xlu0 %38 }
  0x7f   :  { %v75_v26 = vmul.f32 %v50_v20, %v39_v25  ;;  %v77_v27 = vmul.f32 %v58_v21, %v39_v25  ;;  %v76_v28 = vmul.f32 %v54_v22, %v39_v25  ;;  %v78_v29 = vmul.f32 %v62_v23, %v39_v25  ;;  %v383_v25 = vld [vmem:[%s494_s3] sm:$0xff]  }
  0x81   :  { %v105_v30 = vpop.permute.xlu1 %104  ;;  %v116_v32 = vadd.f32 %v100_v24, %v76_v28  ;;  %v118_v33 = vadd.f32 %v100_v24, %v78_v29  ;;  %v115_v34 = vadd.f32 %v100_v24, %v75_v26  ;;  %v117_v38 = vadd.f32 %v100_v24, %v77_v27  ;;  %v384_v26 = vld [vmem:[%s494_s3 + $0x8] sm:$0xff]  }
  0x82   :  { %v44_v31 = vpop.permute.xlu0 %43 }
  0x83   :  { %v79_v35 = vmul.f32 %v50_v20, %v44_v31  ;;  %v81_v36 = vmul.f32 %v58_v21, %v44_v31  ;;  %v80_v37 = vmul.f32 %v54_v22, %v44_v31  ;;  %v82_v39 = vmul.f32 %v62_v23, %v44_v31 }
  0x84   :  { %v132_v46 = vmax.f32 %v116_v32, 0.0  ;;  %v134_v47 = vmax.f32 %v118_v33, 0.0  ;;  %v131_v48 = vmax.f32 %v115_v34, 0.0  ;;  %v133_v49 = vmax.f32 %v117_v38, 0.0 }
  0x85   :  { %v120_v40 = vadd.f32 %v105_v30, %v80_v37  ;;  %v119_v41 = vadd.f32 %v105_v30, %v79_v35  ;;  %v121_v42 = vadd.f32 %v105_v30, %v81_v36  ;;  %v34_v43 = vpop.permute.xlu1 %33  ;;  %v122_v45 = vadd.f32 %v105_v30, %v82_v39 }
  0x86   :  { %v29_v44 = vpop.permute.xlu0 %28  ;;  %v71_v50 = vmul.f32 %v50_v20, %v34_v43  ;;  %v72_v51 = vmul.f32 %v54_v22, %v34_v43  ;;  %v73_v52 = vmul.f32 %v58_v21, %v34_v43  ;;  %v74_v53 = vmul.f32 %v62_v23, %v34_v43 }
  0x87   :  { %v136_v54 = vmax.f32 %v120_v40, 0.0  ;;  %v138_v55 = vmax.f32 %v122_v45, 0.0  ;;  %v135_v56 = vmax.f32 %v119_v41, 0.0  ;;  %v137_v57 = vmax.f32 %v121_v42, 0.0 }
  0x88   :  { %v67_v58 = vmul.f32 %v50_v20, %v29_v44  ;;  %v68_v59 = vmul.f32 %v54_v22, %v29_v44  ;;  %v69_v60 = vmul.f32 %v58_v21, %v29_v44  ;;  %v70_v61 = vmul.f32 %v62_v23, %v29_v44 }
  0x89   :  { %v95_v62 = vpop.permute.xlu1 %94  ;;  %v148_v9 = vpack.c.bf16 %v136_v54, %v132_v46  ;;  %v150_v10 = vpack.c.bf16 %v138_v55, %v134_v47  ;;  %v147_v11 = vpack.c.bf16 %v135_v56, %v131_v48  ;;  %v149_v12 = vpack.c.bf16 %v137_v57, %v133_v49 }
  0x8a   :  { %v90_v63 = vpop.permute.xlu0 %89  ;;  %v111_v1 = vadd.f32 %v95_v62, %v71_v50  ;;  %v112_v2 = vadd.f32 %v95_v62, %v72_v51  ;;  %v113_v3 = vadd.f32 %v95_v62, %v73_v52  ;;  %v114_v4 = vadd.f32 %v95_v62, %v74_v53 }
  0x8b   :  { %v107_v5 = vadd.f32 %v90_v63, %v67_v58  ;;  %v108_v6 = vadd.f32 %v90_v63, %v68_v59  ;;  %v109_v7 = vadd.f32 %v90_v63, %v69_v60  ;;  %v110_v8 = vadd.f32 %v90_v63, %v70_v61  ;;  %204 = vmatprep.subr.bf16.mxu0 %v148_v9 }
  0x8c   :  { %v128_v14 = vmax.f32 %v112_v2, 0.0  ;;  %v130_v16 = vmax.f32 %v114_v4, 0.0  ;;  %257 = vmatprep.subr.bf16.mxu1 %v150_v10  ;;  %v127_v18 = vmax.f32 %v111_v1, 0.0  ;;  %v129_v20 = vmax.f32 %v113_v3, 0.0  ;;  %205 = vmatpush1.bf16.msra.mxu0 %v147_v11 }
  0x8d   :  { %v124_v13 = vmax.f32 %v108_v6, 0.0  ;;  %v126_v15 = vmax.f32 %v110_v8, 0.0  ;;  %v123_v17 = vmax.f32 %v107_v5, 0.0  ;;  %v125_v19 = vmax.f32 %v109_v7, 0.0  ;;  %258 = vmatpush1.bf16.msra.mxu1 %v149_v12  ;;  %v163_v38 = vpop.permute.xlu1 %162 }
  0x8e   :  { %v158_v29 = vpop.permute.xlu0 %157 }
  0x8f   :  { %v144_v21 = vpack.c.bf16 %v128_v14, %v124_v13  ;;  %v146_v22 = vpack.c.bf16 %v130_v16, %v126_v15  ;;  %v143_v23 = vpack.c.bf16 %v127_v18, %v123_v17  ;;  %v145_v24 = vpack.c.bf16 %v129_v20, %v125_v19 }
  0x91   :  { %206 = vmatprep.subr.bf16.mxu0 %v144_v21  ;;  %259 = vmatprep.subr.bf16.mxu1 %v146_v22  ;;  %v173_v59 = vpop.permute.xlu1 %172 }
  0x92   :  { %207 = vmatpush1.bf16.msra.mxu0 %v143_v23  ;;  %260 = vmatpush1.bf16.msra.mxu1 %v145_v24  ;;  %v168_v48 = vpop.permute.xlu0 %167 }
  0x95   :  { %360 = vmatmul.mubr.msk.bf16.vlgmr.msra.gmra.mxu0 %vm185_vm0, %v383_v25  ;;  %362 = vmatmul.mubr.msk.bf16.vlgmr.msra.gmra.mxu1 %vm185_vm0, %v383_v25 }
  0x96   :  { %234 = vmatprep.mubr.bf16.mxu0 %v385_v0  ;;  %287 = vmatprep.mubr.bf16.mxu1 %v385_v0 }
  0x9d   :  { %361 = vmatmul.mubr.msk.bf16.gmra.mxu0 %vm185_vm0, %v384_v26  ;;  %363 = vmatmul.mubr.msk.bf16.gmra.mxu1 %vm185_vm0, %v384_v26 }
 0x155   :  { %v226_v27 = vpop.f32.mrf.mxu0  ;;  %v279_v28 = vpop.f32.mrf.mxu1 }
 0x156   :  { %v227_v32 = vadd.f32 %v226_v27, %v158_v29  ;;  %v280_v33 = vadd.f32 %v279_v28, %v158_v29 }
 0x157   :  { %v228_v30 = vpop.f32.mrf.mxu0  ;;  %v281_v31 = vpop.f32.mrf.mxu1 }
 0x158   :  { %v229_v34 = vadd.f32 %v228_v30, %v158_v29  ;;  %v282_v35 = vadd.f32 %v281_v31, %v158_v29 }
 0x159   :  { %v230_v36 = vpop.f32.mrf.mxu0  ;;  %v283_v37 = vpop.f32.mrf.mxu1 }
 0x15a   :  { %v372_v39 = vpack.c.bf16 %v229_v34, %v227_v32  ;;  %v373_v0 = vpack.c.bf16 %v282_v35, %v280_v33  ;;  %v231_v42 = vadd.f32 %v230_v36, %v163_v38  ;;  %v284_v43 = vadd.f32 %v283_v37, %v163_v38 }
 0x15b   :  { %v232_v40 = vpop.f32.mrf.mxu0  ;;  %v285_v41 = vpop.f32.mrf.mxu1 }
 0x15c   :  { %346 = vst [vmem:[%s496_s5] sm:$0xff] %v372_v39  ;;  %347 = vst [vmem:[%s496_s5 + $0x8] sm:$0xff] %v373_v0  ;;  %v233_v44 = vadd.f32 %v232_v40, %v163_v38  ;;  %v286_v45 = vadd.f32 %v285_v41, %v163_v38 }
 0x15d   :  { %v236_v46 = vpop.f32.mrf.mxu0  ;;  %v289_v47 = vpop.f32.mrf.mxu1 }
 0x15e   :  { %v374_v49 = vpack.c.bf16 %v233_v44, %v231_v42  ;;  %v375_v50 = vpack.c.bf16 %v286_v45, %v284_v43  ;;  %v237_v53 = vadd.f32 %v236_v46, %v168_v48  ;;  %v290_v54 = vadd.f32 %v289_v47, %v168_v48 }
 0x15f   :  { %v238_v51 = vpop.f32.mrf.mxu0  ;;  %v291_v52 = vpop.f32.mrf.mxu1 }
 0x160   :  { %348 = vst [vmem:[%s496_s5 + $0x10] sm:$0xff] %v374_v49  ;;  %349 = vst [vmem:[%s496_s5 + $0x18] sm:$0xff] %v375_v50  ;;  %v239_v55 = vadd.f32 %v238_v51, %v168_v48  ;;  %v292_v56 = vadd.f32 %v291_v52, %v168_v48 }
 0x161   :  { %v240_v57 = vpop.f32.mrf.mxu0  ;;  %v293_v58 = vpop.f32.mrf.mxu1 }
 0x162   :  { %v376_v60 = vpack.c.bf16 %v239_v55, %v237_v53  ;;  %v377_v61 = vpack.c.bf16 %v292_v56, %v290_v54  ;;  %v241_v1 = vadd.f32 %v240_v57, %v173_v59  ;;  %v294_v2 = vadd.f32 %v293_v58, %v173_v59 }
 0x163   :  { %v242_v62 = vpop.f32.mrf.mxu0  ;;  %v295_v63 = vpop.f32.mrf.mxu1 }
 0x164   :  { %350 = vst [vmem:[%s496_s5 + $0x20] sm:$0xff] %v376_v60  ;;  %351 = vst [vmem:[%s496_s5 + $0x28] sm:$0xff] %v377_v61  ;;  %v243_v3 = vadd.f32 %v242_v62, %v173_v59  ;;  %v296_v4 = vadd.f32 %v295_v63, %v173_v59 }
 0x166   :  { %v378_v5 = vpack.c.bf16 %v243_v3, %v241_v1  ;;  %v379_v6 = vpack.c.bf16 %v296_v4, %v294_v2 }
 0x168   :  { %352 = vst [vmem:[%s496_s5 + $0x30] sm:$0xff] %v378_v5  ;;  %353 = vst [vmem:[%s496_s5 + $0x38] sm:$0xff] %v379_v6 }

// kernel: neuralpcg_forward.6
= control target key start
LH: loop header
LB: loop body
LE: loop exit
PB: predicated region body
PF: predicated region fallthrough
CT: control target
= control target key end

     0   :  { %v1193_v0 = vmov 0   ;;  %v71_v21 = vlaneseq  ;;  %vm209_vm0 = vcmask 261120   ;;  %s1471_s4 = inlined_call_operand.vmem [shape: f32[32,1], index: 4, kind: input, shape index: {}]   ;;  %s1472_s3 = inlined_call_operand.vmem [shape: f32[32,1], index: 3, kind: input, shape index: {}]   ;;  %s1473_s6 = inlined_call_operand.vmem [shape: f32[32,1], index: 6, kind: input, shape index: {}]   ;;  %s1474_s5 = inlined_call_operand.vmem [shape: bf16[32,32], index: 5, kind: input, shape index: {}]   ;;  %s1475_s10 = inlined_call_operand.vmem [shape: f32[32,1], index: 10, kind: input, shape index: {}]   ;;  %s1476_s12 = inlined_call_operand.vmem [shape: f32[32,1], index: 12, kind: input, shape index: {}]   ;;  %s1477_s1 = inlined_call_operand.vmem [shape: bf16[32,512], index: 1, kind: input, shape index: {}]   ;;  %s1478_s8 = inlined_call_operand.vmem [shape: bf16[32,32], index: 8, kind: input, shape index: {}]   ;;  %s1479_s0 = inlined_call_operand.vmem [shape: bf16[32,512], index: 0, kind: input, shape index: {}]   ;;  %s1480_s7 = inlined_call_operand.vmem [shape: bf16[32,32], index: 7, kind: input, shape index: {}]   ;;  %s1481_s2 = inlined_call_operand.vmem [shape: f32[1,512], index: 2, kind: input, shape index: {}]   ;;  %s1482_s9 = inlined_call_operand.vmem [shape: bf16[32,32], index: 9, kind: input, shape index: {}]   ;;  %s1483_s11 = inlined_call_operand.vmem [shape: bf16[32,32], index: 11, kind: input, shape index: {}]   ;;  %s1484_s13 = inlined_call_operand.vmem [shape: bf16[32,512], index: 13, kind: output, shape index: {}]  }
   0x1   :  { %1158 = vset.pattern.permute.xlu1 %v1193_v0  ;;  %1157 = vset.pattern.permute.xlu0 %v1193_v0  ;;  %v109_v1 = vld [vmem:[%s1471_s4 + $0x10] sm:$0xff]  ;;  %v110_v3 = vld [vmem:[%s1471_s4 + $0x18] sm:$0xff]  ;;  %v46_v5 = vld [vmem:[%s1472_s3 + $0x8] sm:$0xff] }
   0x2   :  { %v47_v2 = vld [vmem:[%s1472_s3 + $0x10] sm:$0xff]  ;;  %123 = vperm.xlu1 %1158, %v109_v1   ;;  %v48_v4 = vld [vmem:[%s1472_s3 + $0x18] sm:$0xff]  ;;  %248 = vmatprep.mubr.bf16.mxu0 %v1193_v0  ;;  %v45_v6 = vld [vmem:[%s1472_s3] sm:$0xff]  ;;  %v72_v22 = vshrl.u32 %v71_v21, 7 }
   0x3   :  { %62 = vperm.xlu0 %1157, %v47_v2   ;;  %301 = vmatprep.mubr.bf16.mxu1 %v1193_v0  ;;  %v108_v7 = vld [vmem:[%s1471_s4 + $0x8] sm:$0xff]  ;;  %v107_v8 = vld [vmem:[%s1471_s4] sm:$0xff]  ;;  %v178_v9 = vld [vmem:[%s1473_s6 + $0x18] sm:$0xff] }
   0x4   :  { %v177_v10 = vld [vmem:[%s1473_s6 + $0x10] sm:$0xff]  ;;  %v176_v11 = vld [vmem:[%s1473_s6 + $0x8] sm:$0xff]  ;;  %v175_v12 = vld [vmem:[%s1473_s6] sm:$0xff]  ;;  %v73_v23 = vsub.s32 0, %v72_v22  ;;  %v81_v24 = vsub.s32 2, %v72_v22  ;;  %v77_v25 = vsub.s32 1, %v72_v22 }
   0x5   :  { %v823_v13 = vld [vmem:[%s1475_s10 + $0x18] sm:$0xff]  ;;  %v822_v14 = vld [vmem:[%s1475_s10 + $0x10] sm:$0xff]  ;;  %v821_v15 = vld [vmem:[%s1475_s10 + $0x8] sm:$0xff]  ;;  %v85_v26 = vsub.s32 3, %v72_v22 }
   0x6   :  { %128 = vperm.xlu1 %1158, %v110_v3   ;;  %v820_v16 = vld [vmem:[%s1475_s10] sm:$0xff]  ;;  %v889_v17 = vld [vmem:[%s1476_s12 + $0x8] sm:$0xff]  ;;  %v891_v19 = vld [vmem:[%s1476_s12 + $0x18] sm:$0xff] }
   0x7   :  { %67 = vperm.xlu0 %1157, %v48_v4   ;;  %v888_v18 = vld [vmem:[%s1476_s12] sm:$0xff]  ;;  %v890_v20 = vld [vmem:[%s1476_s12 + $0x10] sm:$0xff] }
   0x8   :  { %v49_v27 = vld [vmem:[%s1481_s2] sm:$0xf] }
   0x9   :  { %v74_v28 = vrot.slane %v49_v27, %v73_v23  ;;  %v82_v29 = vrot.slane %v49_v27, %v81_v24  ;;  %v78_v30 = vrot.slane %v49_v27, %v77_v25  ;;  %v86_v31 = vrot.slane %v49_v27, %v85_v26 }
   0xa   :  { %57 = vperm.xlu1 %1158, %v46_v5  }
   0xb   :  { %52 = vperm.xlu0 %1157, %v45_v6  }
   0xe   :  { %118 = vperm.xlu1 %1158, %v108_v7  }
   0xf   :  { %113 = vperm.xlu0 %1157, %v107_v8  }
  0x12   :  { %196 = vperm.xlu1 %1158, %v178_v9  }
  0x13   :  { %191 = vperm.xlu0 %1157, %v177_v10  }
  0x16   :  { %186 = vperm.xlu1 %1158, %v176_v11  }
  0x17   :  { %181 = vperm.xlu0 %1157, %v175_v12  }
  0x1a   :  { %841 = vperm.xlu1 %1158, %v823_v13  }
  0x1b   :  { %836 = vperm.xlu0 %1157, %v822_v14  }
  0x1e   :  { %831 = vperm.xlu1 %1158, %v821_v15  }
  0x1f   :  { %826 = vperm.xlu0 %1157, %v820_v16  }
  0x22   :  { %899 = vperm.xlu1 %1158, %v889_v17  }
  0x23   :  { %894 = vperm.xlu0 %1157, %v888_v18  }
  0x26   :  { %909 = vperm.xlu1 %1158, %v891_v19  }
  0x27   :  { %904 = vperm.xlu0 %1157, %v890_v20  }
  0x7d   :  { %v124_v32 = vpop.permute.xlu1 %123 }
  0x7e   :  { %v63_v33 = vpop.permute.xlu0 %62 }
  0x7f   :  { %v99_v34 = vmul.f32 %v74_v28, %v63_v33  ;;  %v101_v35 = vmul.f32 %v82_v29, %v63_v33  ;;  %v100_v36 = vmul.f32 %v78_v30, %v63_v33  ;;  %v102_v37 = vmul.f32 %v86_v31, %v63_v33  ;;  %v1163_v33 = vld [vmem:[%s1477_s1 + $0x24] ss:$16 sps:$4 sm:$0xff]  }
  0x81   :  { %v129_v38 = vpop.permute.xlu1 %128  ;;  %v140_v40 = vadd.f32 %v124_v32, %v100_v36  ;;  %v142_v41 = vadd.f32 %v124_v32, %v102_v37  ;;  %v139_v42 = vadd.f32 %v124_v32, %v99_v34  ;;  %v141_v46 = vadd.f32 %v124_v32, %v101_v35  ;;  %v1166_v34 = vld [vmem:[%s1477_s1 + $0x2c] ss:$16 sps:$4 sm:$0xff]   ;;  %v1159_v35 = vld [vmem:[%s1474_s5] sm:$0xff]   ;;  %v1164_v37 = vld [vmem:[%s1477_s1 + $0x28] ss:$16 sps:$4 sm:$0xff]  }
  0x82   :  { %v68_v39 = vpop.permute.xlu0 %67  ;;  %v1161_v36 = vld [vmem:[%s1477_s1 + $0x20] ss:$16 sps:$4 sm:$0xff]  }
  0x83   :  { %v103_v43 = vmul.f32 %v74_v28, %v68_v39  ;;  %v105_v44 = vmul.f32 %v82_v29, %v68_v39  ;;  %v104_v45 = vmul.f32 %v78_v30, %v68_v39  ;;  %v106_v47 = vmul.f32 %v86_v31, %v68_v39  ;;  %v1172_v39 = vld [vmem:[%s1477_s1 + $0xc] ss:$16 sps:$4 sm:$0xff]  }
  0x84   :  { %v156_v54 = vmax.f32 %v140_v40, 0.0  ;;  %v158_v55 = vmax.f32 %v142_v41, 0.0  ;;  %v155_v56 = vmax.f32 %v139_v42, 0.0  ;;  %v157_v57 = vmax.f32 %v141_v46, 0.0  ;;  %v1167_v40 = vld [vmem:[%s1477_s1] ss:$16 sps:$4 sm:$0xff]  }
  0x85   :  { %v144_v48 = vadd.f32 %v129_v38, %v104_v45  ;;  %v143_v49 = vadd.f32 %v129_v38, %v103_v43  ;;  %v145_v50 = vadd.f32 %v129_v38, %v105_v44  ;;  %v58_v51 = vpop.permute.xlu1 %57  ;;  %v146_v53 = vadd.f32 %v129_v38, %v106_v47  ;;  %v1169_v38 = vld [vmem:[%s1477_s1 + $0x4] ss:$16 sps:$4 sm:$0xff]   ;;  %v1170_v41 = vld [vmem:[%s1477_s1 + $0x8] ss:$16 sps:$4 sm:$0xff]   ;;  %v1180_v43 = vld [vmem:[%s1479_s0 + $0x2c] ss:$16 sps:$4 sm:$0xff]  }
  0x86   :  { %v53_v52 = vpop.permute.xlu0 %52  ;;  %v95_v58 = vmul.f32 %v74_v28, %v58_v51  ;;  %v96_v59 = vmul.f32 %v78_v30, %v58_v51  ;;  %v97_v60 = vmul.f32 %v82_v29, %v58_v51  ;;  %v98_v61 = vmul.f32 %v86_v31, %v58_v51  ;;  %v1177_v42 = vld [vmem:[%s1479_s0 + $0x24] ss:$16 sps:$4 sm:$0xff]   ;;  %v1160_v44 = vld [vmem:[%s1474_s5 + $0x8] sm:$0xff]   ;;  %v1175_v46 = vld [vmem:[%s1479_s0 + $0x20] ss:$16 sps:$4 sm:$0xff]  }
  0x87   :  { %v160_v62 = vmax.f32 %v144_v48, 0.0  ;;  %v162_v63 = vmax.f32 %v146_v53, 0.0  ;;  %v159_v1 = vmax.f32 %v143_v49, 0.0  ;;  %v161_v2 = vmax.f32 %v145_v50, 0.0  ;;  %v1173_v45 = vld [vmem:[%s1478_s8] sm:$0xff]  }
  0x88   :  { %v91_v3 = vmul.f32 %v74_v28, %v53_v52  ;;  %v92_v4 = vmul.f32 %v78_v30, %v53_v52  ;;  %v93_v5 = vmul.f32 %v82_v29, %v53_v52  ;;  %v94_v6 = vmul.f32 %v86_v31, %v53_v52  ;;  %v1178_v47 = vld [vmem:[%s1479_s0 + $0x28] ss:$16 sps:$4 sm:$0xff]   ;;  %v1183_v48 = vld [vmem:[%s1479_s0 + $0x4] ss:$16 sps:$4 sm:$0xff]   ;;  %v1186_v49 = vld [vmem:[%s1479_s0 + $0xc] ss:$16 sps:$4 sm:$0xff]  }
  0x89   :  { %v119_v7 = vpop.permute.xlu1 %118  ;;  %v172_v17 = vpack.c.bf16 %v160_v62, %v156_v54  ;;  %v174_v18 = vpack.c.bf16 %v162_v63, %v158_v55  ;;  %v171_v19 = vpack.c.bf16 %v159_v1, %v155_v56  ;;  %v173_v20 = vpack.c.bf16 %v161_v2, %v157_v57  ;;  %v1181_v50 = vld [vmem:[%s1479_s0] ss:$16 sps:$4 sm:$0xff]   ;;  %v1184_v51 = vld [vmem:[%s1479_s0 + $0x8] ss:$16 sps:$4 sm:$0xff]  }
  0x8a   :  { %v114_v8 = vpop.permute.xlu0 %113  ;;  %v135_v9 = vadd.f32 %v119_v7, %v95_v58  ;;  %v136_v10 = vadd.f32 %v119_v7, %v96_v59  ;;  %v137_v11 = vadd.f32 %v119_v7, %v97_v60  ;;  %v138_v12 = vadd.f32 %v119_v7, %v98_v61  ;;  %v1174_v52 = vld [vmem:[%s1478_s8 + $0x8] sm:$0xff]   ;;  %v1187_v53 = vld [vmem:[%s1480_s7] sm:$0xff]  }
  0x8b   :  { %v131_v13 = vadd.f32 %v114_v8, %v91_v3  ;;  %v132_v14 = vadd.f32 %v114_v8, %v92_v4  ;;  %v133_v15 = vadd.f32 %v114_v8, %v93_v5  ;;  %v134_v16 = vadd.f32 %v114_v8, %v94_v6  ;;  %228 = vmatprep.subr.bf16.mxu0 %v172_v17  ;;  %v1188_v54 = vld [vmem:[%s1480_s7 + $0x8] sm:$0xff]  }
  0x8c   :  { %v152_v22 = vmax.f32 %v136_v10, 0.0  ;;  %v154_v24 = vmax.f32 %v138_v12, 0.0  ;;  %281 = vmatprep.subr.bf16.mxu1 %v174_v18  ;;  %v151_v26 = vmax.f32 %v135_v9, 0.0  ;;  %v153_v28 = vmax.f32 %v137_v11, 0.0  ;;  %229 = vmatpush1.bf16.msra.mxu0 %v171_v19 }
  0x8d   :  { %v148_v21 = vmax.f32 %v132_v14, 0.0  ;;  %v150_v23 = vmax.f32 %v134_v16, 0.0  ;;  %v147_v25 = vmax.f32 %v131_v13, 0.0  ;;  %v149_v27 = vmax.f32 %v133_v15, 0.0  ;;  %282 = vmatpush1.bf16.msra.mxu1 %v173_v20  ;;  %v197_v63 = vpop.permute.xlu1 %196 }
  0x8e   :  { %v192_v3 = vpop.permute.xlu0 %191 }
  0x8f   :  { %v168_v29 = vpack.c.bf16 %v152_v22, %v148_v21  ;;  %v170_v30 = vpack.c.bf16 %v154_v24, %v150_v23  ;;  %v167_v31 = vpack.c.bf16 %v151_v26, %v147_v25  ;;  %v169_v32 = vpack.c.bf16 %v153_v28, %v149_v27 }
  0x91   :  { %230 = vmatprep.subr.bf16.mxu0 %v168_v29  ;;  %283 = vmatprep.subr.bf16.mxu1 %v170_v30  ;;  %v187_v8 = vpop.permute.xlu1 %186 }
  0x92   :  { %231 = vmatpush1.bf16.msra.mxu0 %v167_v31  ;;  %284 = vmatpush1.bf16.msra.mxu1 %v169_v32  ;;  %v182_v19 = vpop.permute.xlu0 %181 }
  0x93   :  { %414 = vmatprep.subr.bf16.mxu0 %v1163_v33  ;;  %467 = vmatprep.subr.bf16.mxu1 %v1166_v34 }
  0x95   :  { %1096 = vmatmul.mubr.msk.bf16.vlgmr.msra.gmra.mxu0 %vm209_vm0, %v1159_v35  ;;  %1098 = vmatmul.mubr.msk.bf16.vlgmr.msra.gmra.mxu1 %vm209_vm0, %v1159_v35 }
  0x96   :  { %258 = vmatprep.mubr.bf16.mxu0 %v1193_v0  ;;  %311 = vmatprep.mubr.bf16.mxu1 %v1193_v0 }
  0x97   :  { %415 = vmatpush1.bf16.msra.mxu0 %v1161_v36  ;;  %468 = vmatpush1.bf16.msra.mxu1 %v1164_v37  ;;  %v1189_v36 = vld [vmem:[%s1482_s9] sm:$0xff]   ;;  %v1190_v37 = vld [vmem:[%s1482_s9 + $0x8] sm:$0xff]  }
  0x98   :  { %416 = vmatprep.subr.bf16.mxu0 %v1169_v38  ;;  %469 = vmatprep.subr.bf16.mxu1 %v1172_v39 }
  0x9b   :  { %417 = vmatpush1.bf16.msra.mxu0 %v1167_v40  ;;  %470 = vmatpush1.bf16.msra.mxu1 %v1170_v41 }
  0x9c   :  { %576 = vmatprep.subr.bf16.mxu0 %v1177_v42  ;;  %629 = vmatprep.subr.bf16.mxu1 %v1180_v43 }
  0x9d   :  { %1097 = vmatmul.mubr.msk.bf16.gmra.mxu0 %vm209_vm0, %v1160_v44  ;;  %1099 = vmatmul.mubr.msk.bf16.gmra.mxu1 %vm209_vm0, %v1160_v44 }
  0x9e   :  { %434 = vmatprep.mubr.bf16.mxu0 %v1193_v0  ;;  %487 = vmatprep.mubr.bf16.mxu1 %v1193_v0 }
  0xa5   :  { %1110 = vmatmul.mubr.msk.bf16.vlgmr.msra.gmra.mxu0 %vm209_vm0, %v1173_v45  ;;  %1112 = vmatmul.mubr.msk.bf16.vlgmr.msra.gmra.mxu1 %vm209_vm0, %v1173_v45 }
  0xa6   :  { %444 = vmatprep.mubr.bf16.mxu0 %v1193_v0  ;;  %497 = vmatprep.mubr.bf16.mxu1 %v1193_v0 }
  0xa7   :  { %577 = vmatpush1.bf16.msra.mxu0 %v1175_v46  ;;  %630 = vmatpush1.bf16.msra.mxu1 %v1178_v47 }
  0xa8   :  { %578 = vmatprep.subr.bf16.mxu0 %v1183_v48  ;;  %631 = vmatprep.subr.bf16.mxu1 %v1186_v49 }
  0xab   :  { %579 = vmatpush1.bf16.msra.mxu0 %v1181_v50  ;;  %632 = vmatpush1.bf16.msra.mxu1 %v1184_v51 }
  0xad   :  { %1111 = vmatmul.mubr.msk.bf16.gmra.mxu0 %vm209_vm0, %v1174_v52  ;;  %1113 = vmatmul.mubr.msk.bf16.gmra.mxu1 %vm209_vm0, %v1174_v52 }
  0xae   :  { %596 = vmatprep.mubr.bf16.mxu0 %v1193_v0  ;;  %649 = vmatprep.mubr.bf16.mxu1 %v1193_v0 }
  0xb5   :  { %1124 = vmatmul.mubr.msk.bf16.vlgmr.msra.gmra.mxu0 %vm209_vm0, %v1187_v53  ;;  %1126 = vmatmul.mubr.msk.bf16.vlgmr.msra.gmra.mxu1 %vm209_vm0, %v1187_v53 }
  0xb6   :  { %606 = vmatprep.mubr.bf16.mxu0 %v1193_v0  ;;  %659 = vmatprep.mubr.bf16.mxu1 %v1193_v0 }
  0xbd   :  { %1125 = vmatmul.mubr.msk.bf16.gmra.mxu0 %vm209_vm0, %v1188_v54  ;;  %1127 = vmatmul.mubr.msk.bf16.gmra.mxu1 %vm209_vm0, %v1188_v54 }
  0xbe   :  { %730 = vmatprep.mubr.bf16.mxu0 %v1193_v0  ;;  %783 = vmatprep.mubr.bf16.mxu1 %v1193_v0 }
 0x155   :  { %v250_v55 = vpop.f32.mrf.mxu0  ;;  %v303_v56 = vpop.f32.mrf.mxu1 }
 0x156   :  { %v251_v32 = vadd.f32 %v250_v55, %v182_v19  ;;  %v304_v33 = vadd.f32 %v303_v56, %v182_v19 }
 0x157   :  { %v252_v57 = vpop.f32.mrf.mxu0  ;;  %v305_v58 = vpop.f32.mrf.mxu1 }
 0x158   :  { %v253_v22 = vadd.f32 %v252_v57, %v182_v19  ;;  %v306_v23 = vadd.f32 %v305_v58, %v182_v19 }
 0x159   :  { %v254_v59 = vpop.f32.mrf.mxu0  ;;  %v307_v60 = vpop.f32.mrf.mxu1 }
 0x15a   :  { %v255_v26 = vadd.f32 %v254_v59, %v187_v8  ;;  %v308_v27 = vadd.f32 %v307_v60, %v187_v8 }
 0x15b   :  { %v256_v61 = vpop.f32.mrf.mxu0  ;;  %v309_v62 = vpop.f32.mrf.mxu1 }
 0x15c   :  { %v257_v9 = vadd.f32 %v256_v61, %v187_v8  ;;  %v310_v10 = vadd.f32 %v309_v62, %v187_v8  ;;  %v674_v34 = vpack.c.bf16 %v255_v26, %v251_v32  ;;  %v676_v35 = vpack.c.bf16 %v308_v27, %v304_v33 }
 0x15d   :  { %v260_v1 = vpop.f32.mrf.mxu0  ;;  %v313_v2 = vpop.f32.mrf.mxu1 }
 0x15e   :  { %v261_v20 = vadd.f32 %v260_v1, %v192_v3  ;;  %v314_v21 = vadd.f32 %v313_v2, %v192_v3  ;;  %v675_v30 = vpack.c.bf16 %v257_v9, %v253_v22  ;;  %v677_v31 = vpack.c.bf16 %v310_v10, %v306_v23 }
 0x15f   :  { %v262_v4 = vpop.f32.mrf.mxu0  ;;  %v315_v5 = vpop.f32.mrf.mxu1 }
 0x160   :  { %v263_v15 = vadd.f32 %v262_v4, %v192_v3  ;;  %v316_v16 = vadd.f32 %v315_v5, %v192_v3 }
 0x161   :  { %v264_v6 = vpop.f32.mrf.mxu0  ;;  %v317_v7 = vpop.f32.mrf.mxu1 }
 0x162   :  { %v265_v11 = vadd.f32 %v264_v6, %v197_v63  ;;  %v318_v12 = vadd.f32 %v317_v7, %v197_v63 }
 0x163   :  { %v266_v13 = vpop.f32.mrf.mxu0  ;;  %v319_v14 = vpop.f32.mrf.mxu1 }
 0x164   :  { %v267_v17 = vadd.f32 %v266_v13, %v197_v63  ;;  %v320_v18 = vadd.f32 %v319_v14, %v197_v63  ;;  %v678_v28 = vpack.c.bf16 %v265_v11, %v261_v20  ;;  %v680_v29 = vpack.c.bf16 %v318_v12, %v314_v21 }
 0x165   :  { %v436_v38 = vpop.f32.mrf.mxu0  ;;  %v489_v39 = vpop.f32.mrf.mxu1 }
 0x166   :  { %v679_v24 = vpack.c.bf16 %v267_v17, %v263_v15  ;;  %v681_v25 = vpack.c.bf16 %v320_v18, %v316_v16  ;;  %v842_v17 = vpop.permute.xlu1 %841 }
 0x167   :  { %v438_v40 = vpop.f32.mrf.mxu0  ;;  %v491_v41 = vpop.f32.mrf.mxu1 }
 0x168   :  { %710 = vmatprep.subr.bf16.mxu0 %v679_v24  ;;  %763 = vmatprep.subr.bf16.mxu1 %v681_v25 }
 0x169   :  { %711 = vmatpush1.bf16.msra.mxu0 %v678_v28  ;;  %764 = vmatpush1.bf16.msra.mxu1 %v680_v29  ;;  %v440_v42 = vpop.f32.mrf.mxu0  ;;  %v493_v43 = vpop.f32.mrf.mxu1 }
 0x16a   :  { %712 = vmatprep.subr.bf16.mxu0 %v675_v30  ;;  %765 = vmatprep.subr.bf16.mxu1 %v677_v31  ;;  %v837_v28 = vpop.permute.xlu0 %836 }
 0x16b   :  { %v442_v44 = vpop.f32.mrf.mxu0  ;;  %v495_v45 = vpop.f32.mrf.mxu1 }
 0x16d   :  { %713 = vmatpush1.bf16.msra.mxu0 %v674_v34  ;;  %766 = vmatpush1.bf16.msra.mxu1 %v676_v35  ;;  %v446_v46 = vpop.f32.mrf.mxu0  ;;  %v499_v47 = vpop.f32.mrf.mxu1 }
 0x16f   :  { %v448_v48 = vpop.f32.mrf.mxu0  ;;  %v501_v49 = vpop.f32.mrf.mxu1 }
 0x170   :  { %1130 = vmatmul.mubr.msk.bf16.vlgmr.msra.gmra.mxu0 %vm209_vm0, %v1189_v36  ;;  %1132 = vmatmul.mubr.msk.bf16.vlgmr.msra.gmra.mxu1 %vm209_vm0, %v1189_v36 }
 0x171   :  { %740 = vmatprep.mubr.bf16.mxu0 %v1193_v0  ;;  %793 = vmatprep.mubr.bf16.mxu1 %v1193_v0  ;;  %v450_v50 = vpop.f32.mrf.mxu0  ;;  %v503_v51 = vpop.f32.mrf.mxu1 }
 0x173   :  { %v452_v52 = vpop.f32.mrf.mxu0  ;;  %v505_v53 = vpop.f32.mrf.mxu1 }
 0x175   :  { %v598_v54 = vpop.f32.mrf.mxu0  ;;  %v651_v55 = vpop.f32.mrf.mxu1 }
 0x176   :  { %v599_v13 = vadd.f32 %v598_v54, %v436_v38  ;;  %v652_v14 = vadd.f32 %v651_v55, %v489_v39 }
 0x177   :  { %v600_v56 = vpop.f32.mrf.mxu0  ;;  %v653_v57 = vpop.f32.mrf.mxu1 }
 0x178   :  { %1131 = vmatmul.mubr.msk.bf16.gmra.mxu0 %vm209_vm0, %v1190_v37  ;;  %1133 = vmatmul.mubr.msk.bf16.gmra.mxu1 %vm209_vm0, %v1190_v37  ;;  %v601_v18 = vadd.f32 %v600_v56, %v438_v40  ;;  %v654_v19 = vadd.f32 %v653_v57, %v491_v41 }
 0x179   :  { %960 = vmatprep.mubr.bf16.mxu0 %v1193_v0  ;;  %1013 = vmatprep.mubr.bf16.mxu1 %v1193_v0  ;;  %v602_v58 = vpop.f32.mrf.mxu0  ;;  %v655_v59 = vpop.f32.mrf.mxu1 }
 0x17a   :  { %v603_v20 = vadd.f32 %v602_v58, %v440_v42  ;;  %v656_v21 = vadd.f32 %v655_v59, %v493_v43 }
 0x17b   :  { %v604_v60 = vpop.f32.mrf.mxu0  ;;  %v657_v61 = vpop.f32.mrf.mxu1 }
 0x17c   :  { %v605_v22 = vadd.f32 %v604_v60, %v442_v44  ;;  %v658_v23 = vadd.f32 %v657_v61, %v495_v45  ;;  %v827_v60 = vpop.permute.xlu0 %826 }
 0x17d   :  { %v608_v62 = vpop.f32.mrf.mxu0  ;;  %v661_v63 = vpop.f32.mrf.mxu1 }
 0x17e   :  { %v609_v24 = vadd.f32 %v608_v62, %v446_v46  ;;  %v662_v25 = vadd.f32 %v661_v63, %v499_v47 }
 0x17f   :  { %v610_v1 = vpop.f32.mrf.mxu0  ;;  %v663_v2 = vpop.f32.mrf.mxu1 }
 0x180   :  { %v611_v29 = vadd.f32 %v610_v1, %v448_v48  ;;  %v664_v30 = vadd.f32 %v663_v2, %v501_v49  ;;  %v832_v48 = vpop.permute.xlu1 %831 }
 0x181   :  { %v612_v3 = vpop.f32.mrf.mxu0  ;;  %v665_v4 = vpop.f32.mrf.mxu1 }
 0x182   :  { %v613_v31 = vadd.f32 %v612_v3, %v450_v50  ;;  %v666_v32 = vadd.f32 %v665_v4, %v503_v51 }
 0x183   :  { %v614_v5 = vpop.f32.mrf.mxu0  ;;  %v667_v6 = vpop.f32.mrf.mxu1 }
 0x184   :  { %v615_v33 = vadd.f32 %v614_v5, %v452_v52  ;;  %v668_v34 = vadd.f32 %v667_v6, %v505_v53 }
 0x230   :  { %v732_v7 = vpop.f32.mrf.mxu0  ;;  %v785_v8 = vpop.f32.mrf.mxu1 }
 0x231   :  { %v804_v39 = vadd.f32 %v732_v7, %v599_v13  ;;  %v806_v40 = vadd.f32 %v785_v8, %v652_v14 }
 0x232   :  { %v734_v9 = vpop.f32.mrf.mxu0  ;;  %v787_v10 = vpop.f32.mrf.mxu1 }
 0x233   :  { %v805_v41 = vadd.f32 %v734_v9, %v601_v18  ;;  %v807_v42 = vadd.f32 %v787_v10, %v654_v19  ;;  %v844_v19 = vadd.f32 %v827_v60, %v804_v39 }
 0x234   :  { %v736_v11 = vpop.f32.mrf.mxu0  ;;  %v789_v12 = vpop.f32.mrf.mxu1 }
 0x235   :  { %v808_v49 = vadd.f32 %v736_v11, %v603_v20  ;;  %v810_v50 = vadd.f32 %v789_v12, %v656_v21  ;;  %v845_v2 = vadd.f32 %v827_v60, %v805_v41  ;;  %v847_v3 = vadd.f32 %v827_v60, %v807_v42 }
 0x236   :  { %v738_v15 = vpop.f32.mrf.mxu0  ;;  %v791_v16 = vpop.f32.mrf.mxu1  ;;  %v846_v20 = vadd.f32 %v827_v60, %v806_v40 }
 0x237   :  { %v809_v35 = vadd.f32 %v738_v15, %v605_v22  ;;  %v811_v36 = vadd.f32 %v791_v16, %v658_v23  ;;  %v848_v6 = vadd.f32 %v832_v48, %v808_v49  ;;  %v850_v7 = vadd.f32 %v832_v48, %v810_v50  ;;  %v895_v40 = vpop.permute.xlu0 %894 }
 0x238   :  { %v742_v26 = vpop.f32.mrf.mxu0  ;;  %v795_v27 = vpop.f32.mrf.mxu1  ;;  %v861_v23 = vmax.f32 %v845_v2, 0.0 }
 0x239   :  { %v812_v43 = vadd.f32 %v742_v26, %v609_v24  ;;  %v814_v44 = vadd.f32 %v795_v27, %v662_v25  ;;  %v849_v53 = vadd.f32 %v832_v48, %v809_v35  ;;  %v851_v55 = vadd.f32 %v832_v48, %v811_v36  ;;  %v1191_v36 = vld [vmem:[%s1483_s11] sm:$0xff]  }
 0x23a   :  { %v744_v37 = vpop.f32.mrf.mxu0  ;;  %v797_v38 = vpop.f32.mrf.mxu1  ;;  %v863_v24 = vmax.f32 %v847_v3, 0.0  ;;  %v864_v27 = vmax.f32 %v848_v6, 0.0 }
 0x23b   :  { %v813_v45 = vadd.f32 %v744_v37, %v611_v29  ;;  %v815_v46 = vadd.f32 %v797_v38, %v664_v30  ;;  %v852_v4 = vadd.f32 %v837_v28, %v812_v43  ;;  %v854_v5 = vadd.f32 %v837_v28, %v814_v44  ;;  %v1192_v37 = vld [vmem:[%s1483_s11 + $0x8] sm:$0xff]  }
 0x23c   :  { %v746_v47 = vpop.f32.mrf.mxu0  ;;  %v799_v54 = vpop.f32.mrf.mxu1  ;;  %v865_v10 = vmax.f32 %v849_v53, 0.0  ;;  %v867_v11 = vmax.f32 %v851_v55, 0.0 }
 0x23d   :  { %v816_v51 = vadd.f32 %v746_v47, %v613_v31  ;;  %v818_v52 = vadd.f32 %v799_v54, %v666_v32  ;;  %v853_v56 = vadd.f32 %v837_v28, %v813_v45  ;;  %v855_v57 = vadd.f32 %v837_v28, %v815_v46 }
 0x23e   :  { %v748_v58 = vpop.f32.mrf.mxu0  ;;  %v801_v59 = vpop.f32.mrf.mxu1  ;;  %v868_v21 = vmax.f32 %v852_v4, 0.0  ;;  %v870_v22 = vmax.f32 %v854_v5, 0.0  ;;  %v866_v28 = vmax.f32 %v850_v7, 0.0  ;;  %v881_v30 = vpack.c.bf16 %v865_v10, %v861_v23 }
 0x23f   :  { %v856_v61 = vadd.f32 %v842_v17, %v816_v51  ;;  %v858_v62 = vadd.f32 %v842_v17, %v818_v52  ;;  %v817_v63 = vadd.f32 %v748_v58, %v615_v33  ;;  %v819_v1 = vadd.f32 %v801_v59, %v668_v34  ;;  %v905_v59 = vpop.permute.xlu0 %904 }
 0x240   :  { %v869_v14 = vmax.f32 %v853_v56, 0.0  ;;  %v871_v15 = vmax.f32 %v855_v57, 0.0  ;;  %v883_v31 = vpack.c.bf16 %v867_v11, %v863_v24  ;;  %v860_v32 = vmax.f32 %v844_v19, 0.0 }
 0x241   :  { %v857_v8 = vadd.f32 %v842_v17, %v817_v63  ;;  %v859_v9 = vadd.f32 %v842_v17, %v819_v1  ;;  %v872_v12 = vmax.f32 %v856_v61, 0.0  ;;  %v874_v13 = vmax.f32 %v858_v62, 0.0 }
 0x242   :  { %v862_v33 = vmax.f32 %v846_v20, 0.0  ;;  %v880_v34 = vpack.c.bf16 %v864_v27, %v860_v32 }
 0x243   :  { %v873_v16 = vmax.f32 %v857_v8, 0.0  ;;  %v875_v18 = vmax.f32 %v859_v9, 0.0  ;;  %v884_v29 = vpack.c.bf16 %v872_v12, %v868_v21  ;;  %v886_v17 = vpack.c.bf16 %v874_v13, %v870_v22 }
 0x244   :  { %v882_v35 = vpack.c.bf16 %v866_v28, %v862_v33 }
 0x245   :  { %v885_v25 = vpack.c.bf16 %v873_v16, %v869_v14  ;;  %v887_v26 = vpack.c.bf16 %v875_v18, %v871_v15 }
 0x247   :  { %940 = vmatprep.subr.bf16.mxu0 %v885_v25  ;;  %993 = vmatprep.subr.bf16.mxu1 %v887_v26 }
 0x248   :  { %941 = vmatpush1.bf16.msra.mxu0 %v884_v29  ;;  %994 = vmatpush1.bf16.msra.mxu1 %v886_v17 }
 0x249   :  { %942 = vmatprep.subr.bf16.mxu0 %v881_v30  ;;  %995 = vmatprep.subr.bf16.mxu1 %v883_v31 }
 0x24c   :  { %943 = vmatpush1.bf16.msra.mxu0 %v880_v34  ;;  %996 = vmatpush1.bf16.msra.mxu1 %v882_v35 }
 0x24f   :  { %1136 = vmatmul.mubr.msk.bf16.vlgmr.msra.gmra.mxu0 %vm209_vm0, %v1191_v36  ;;  %1138 = vmatmul.mubr.msk.bf16.vlgmr.msra.gmra.mxu1 %vm209_vm0, %v1191_v36 }
 0x250   :  { %970 = vmatprep.mubr.bf16.mxu0 %v1193_v0  ;;  %1023 = vmatprep.mubr.bf16.mxu1 %v1193_v0  ;;  %v900_v0 = vpop.permute.xlu1 %899 }
 0x254   :  { %v910_v7 = vpop.permute.xlu1 %909 }
 0x257   :  { %1137 = vmatmul.mubr.msk.bf16.gmra.mxu0 %vm209_vm0, %v1192_v37  ;;  %1139 = vmatmul.mubr.msk.bf16.gmra.mxu1 %vm209_vm0, %v1192_v37 }
 0x30f   :  { %v962_v38 = vpop.f32.mrf.mxu0  ;;  %v1015_v39 = vpop.f32.mrf.mxu1 }
 0x310   :  { %v963_v43 = vadd.f32 %v962_v38, %v895_v40  ;;  %v1016_v44 = vadd.f32 %v1015_v39, %v895_v40 }
 0x311   :  { %v964_v41 = vpop.f32.mrf.mxu0  ;;  %v1017_v42 = vpop.f32.mrf.mxu1 }
 0x312   :  { %v965_v45 = vadd.f32 %v964_v41, %v895_v40  ;;  %v1018_v46 = vadd.f32 %v1017_v42, %v895_v40 }
 0x313   :  { %v966_v47 = vpop.f32.mrf.mxu0  ;;  %v1019_v54 = vpop.f32.mrf.mxu1 }
 0x314   :  { %v1148_v48 = vpack.c.bf16 %v965_v45, %v963_v43  ;;  %v1149_v49 = vpack.c.bf16 %v1018_v46, %v1016_v44  ;;  %v967_v52 = vadd.f32 %v966_v47, %v900_v0  ;;  %v1020_v53 = vadd.f32 %v1019_v54, %v900_v0 }
 0x315   :  { %v968_v50 = vpop.f32.mrf.mxu0  ;;  %v1021_v51 = vpop.f32.mrf.mxu1 }
 0x316   :  { %1082 = vst [vmem:[%s1484_s13] sm:$0xff] %v1148_v48  ;;  %1083 = vst [vmem:[%s1484_s13 + $0x8] sm:$0xff] %v1149_v49  ;;  %v969_v55 = vadd.f32 %v968_v50, %v900_v0  ;;  %v1022_v56 = vadd.f32 %v1021_v51, %v900_v0 }
 0x317   :  { %v972_v57 = vpop.f32.mrf.mxu0  ;;  %v1025_v58 = vpop.f32.mrf.mxu1 }
 0x318   :  { %v1150_v60 = vpack.c.bf16 %v969_v55, %v967_v52  ;;  %v1151_v61 = vpack.c.bf16 %v1022_v56, %v1020_v53  ;;  %v973_v1 = vadd.f32 %v972_v57, %v905_v59  ;;  %v1026_v2 = vadd.f32 %v1025_v58, %v905_v59 }
 0x319   :  { %v974_v62 = vpop.f32.mrf.mxu0  ;;  %v1027_v63 = vpop.f32.mrf.mxu1 }
 0x31a   :  { %1084 = vst [vmem:[%s1484_s13 + $0x10] sm:$0xff] %v1150_v60  ;;  %1085 = vst [vmem:[%s1484_s13 + $0x18] sm:$0xff] %v1151_v61  ;;  %v975_v3 = vadd.f32 %v974_v62, %v905_v59  ;;  %v1028_v4 = vadd.f32 %v1027_v63, %v905_v59 }
 0x31b   :  { %v976_v5 = vpop.f32.mrf.mxu0  ;;  %v1029_v6 = vpop.f32.mrf.mxu1 }
 0x31c   :  { %v1152_v8 = vpack.c.bf16 %v975_v3, %v973_v1  ;;  %v1153_v9 = vpack.c.bf16 %v1028_v4, %v1026_v2  ;;  %v977_v12 = vadd.f32 %v976_v5, %v910_v7  ;;  %v1030_v13 = vadd.f32 %v1029_v6, %v910_v7 }
 0x31d   :  { %v978_v10 = vpop.f32.mrf.mxu0  ;;  %v1031_v11 = vpop.f32.mrf.mxu1 }
 0x31e   :  { %1086 = vst [vmem:[%s1484_s13 + $0x20] sm:$0xff] %v1152_v8  ;;  %1087 = vst [vmem:[%s1484_s13 + $0x28] sm:$0xff] %v1153_v9  ;;  %v979_v14 = vadd.f32 %v978_v10, %v910_v7  ;;  %v1032_v15 = vadd.f32 %v1031_v11, %v910_v7 }
 0x320   :  { %v1154_v16 = vpack.c.bf16 %v979_v14, %v977_v12  ;;  %v1155_v18 = vpack.c.bf16 %v1032_v15, %v1030_v13 }
 0x322   :  { %1088 = vst [vmem:[%s1484_s13 + $0x30] sm:$0xff] %v1154_v16  ;;  %1089 = vst [vmem:[%s1484_s13 + $0x38] sm:$0xff] %v1155_v18 }

// kernel: neuralpcg_forward.7
= control target key start
LH: loop header
LB: loop body
LE: loop exit
PB: predicated region body
PF: predicated region fallthrough
CT: control target
= control target key end

     0   :  { %v774_v1 = vmov 0   ;;  %vm104_vm0 = vcmask 261120   ;;  %v219_v35 = vlaneseq  ;;  %s963_s1 = inlined_call_operand.vmem [shape: bf16[32,512], index: 1, kind: input, shape index: {}]   ;;  %s964_s4 = inlined_call_operand.vmem [shape: bf16[32,32], index: 4, kind: input, shape index: {}]   ;;  %s965_s0 = inlined_call_operand.vmem [shape: bf16[32,512], index: 0, kind: input, shape index: {}]   ;;  %s966_s3 = inlined_call_operand.vmem [shape: bf16[32,32], index: 3, kind: input, shape index: {}]   ;;  %s967_s5 = inlined_call_operand.vmem [shape: f32[32,1], index: 5, kind: input, shape index: {}]   ;;  %s968_s7 = inlined_call_operand.vmem [shape: f32[32,1], index: 7, kind: input, shape index: {}]   ;;  %s969_s6 = inlined_call_operand.vmem [shape: bf16[32,32], index: 6, kind: input, shape index: {}]   ;;  %s970_s2 = inlined_call_operand.vmem [shape: f32[1,512], index: 2, kind: input, shape index: {}]   ;;  %s971_s8 = inlined_call_operand.vmem [shape: bf16[32,512], index: 8, kind: output, shape index: {}]  }
   0x1   :  { %v744_v0 = vld [vmem:[%s963_s1 + $0x24] ss:$16 sps:$4 sm:$0xff]   ;;  %143 = vmatprep.mubr.bf16.mxu0 %v774_v1  ;;  %196 = vmatprep.mubr.bf16.mxu1 %v774_v1  ;;  %v746_v2 = vld [vmem:[%s963_s1 + $0x2c] ss:$16 sps:$4 sm:$0xff]   ;;  %v748_v3 = vld [vmem:[%s963_s1 + $0x20] ss:$16 sps:$4 sm:$0xff]  }
   0x2   :  { %742 = vset.pattern.permute.xlu0 %v774_v1  ;;  %743 = vset.pattern.permute.xlu1 %v774_v1  ;;  %v749_v4 = vld [vmem:[%s963_s1 + $0x28] ss:$16 sps:$4 sm:$0xff]   ;;  %v750_v5 = vld [vmem:[%s963_s1 + $0x4] ss:$16 sps:$4 sm:$0xff]   ;;  %v752_v6 = vld [vmem:[%s963_s1 + $0xc] ss:$16 sps:$4 sm:$0xff]  }
   0x3   :  { %123 = vmatprep.subr.bf16.mxu0 %v744_v0  ;;  %176 = vmatprep.subr.bf16.mxu1 %v746_v2  ;;  %v754_v7 = vld [vmem:[%s963_s1] ss:$16 sps:$4 sm:$0xff]   ;;  %v755_v8 = vld [vmem:[%s963_s1 + $0x8] ss:$16 sps:$4 sm:$0xff]   ;;  %v760_v10 = vld [vmem:[%s965_s0 + $0x24] ss:$16 sps:$4 sm:$0xff]  }
   0x4   :  { %124 = vmatpush1.bf16.msra.mxu0 %v748_v3  ;;  %177 = vmatpush1.bf16.msra.mxu1 %v749_v4  ;;  %v756_v9 = vld [vmem:[%s964_s4] sm:$0xff]   ;;  %v763_v12 = vld [vmem:[%s965_s0 + $0x2c] ss:$16 sps:$4 sm:$0xff]   ;;  %v761_v13 = vld [vmem:[%s965_s0 + $0x28] ss:$16 sps:$4 sm:$0xff]   ;;  %v220_v40 = vshrl.u32 %v219_v35, 7 }
   0x5   :  { %125 = vmatprep.subr.bf16.mxu0 %v750_v5  ;;  %178 = vmatprep.subr.bf16.mxu1 %v752_v6  ;;  %v758_v11 = vld [vmem:[%s965_s0 + $0x20] ss:$16 sps:$4 sm:$0xff]   ;;  %v766_v14 = vld [vmem:[%s965_s0 + $0x4] ss:$16 sps:$4 sm:$0xff]   ;;  %v769_v15 = vld [vmem:[%s965_s0 + $0xc] ss:$16 sps:$4 sm:$0xff]  }
   0x6   :  { %v764_v16 = vld [vmem:[%s965_s0] ss:$16 sps:$4 sm:$0xff]   ;;  %v767_v17 = vld [vmem:[%s965_s0 + $0x8] ss:$16 sps:$4 sm:$0xff]   ;;  %v221_v45 = vsub.s32 0, %v220_v40  ;;  %v229_v46 = vsub.s32 2, %v220_v40 }
   0x7   :  { %v419_v18 = vld [vmem:[%s967_s5 + $0x10] sm:$0xff]  ;;  %v757_v19 = vld [vmem:[%s964_s4 + $0x8] sm:$0xff]   ;;  %v417_v20 = vld [vmem:[%s967_s5] sm:$0xff]  ;;  %v225_v50 = vsub.s32 1, %v220_v40  ;;  %v233_v51 = vsub.s32 3, %v220_v40 }
   0x8   :  { %126 = vmatpush1.bf16.msra.mxu0 %v754_v7  ;;  %179 = vmatpush1.bf16.msra.mxu1 %v755_v8  ;;  %v420_v21 = vld [vmem:[%s967_s5 + $0x18] sm:$0xff]  ;;  %v418_v22 = vld [vmem:[%s967_s5 + $0x8] sm:$0xff]  ;;  %v485_v23 = vld [vmem:[%s968_s7] sm:$0xff] }
   0x9   :  { %323 = vmatprep.subr.bf16.mxu0 %v760_v10  ;;  %376 = vmatprep.subr.bf16.mxu1 %v763_v12  ;;  %v486_v24 = vld [vmem:[%s968_s7 + $0x8] sm:$0xff]  ;;  %v770_v25 = vld [vmem:[%s966_s3] sm:$0xff]   ;;  %v487_v26 = vld [vmem:[%s968_s7 + $0x10] sm:$0xff] }
   0xa   :  { %433 = vperm.xlu0 %742, %v419_v18   ;;  %423 = vperm.xlu1 %743, %v417_v20   ;;  %v488_v27 = vld [vmem:[%s968_s7 + $0x18] sm:$0xff]  ;;  %v771_v28 = vld [vmem:[%s966_s3 + $0x8] sm:$0xff]   ;;  %v217_v49 = vld [vmem:[%s970_s2] sm:$0xf] }
   0xb   :  { %701 = vmatmul.mubr.msk.bf16.vlgmr.msra.gmra.mxu0 %vm104_vm0, %v756_v9  ;;  %703 = vmatmul.mubr.msk.bf16.vlgmr.msra.gmra.mxu1 %vm104_vm0, %v756_v9  ;;  %v222_v54 = vrot.slane %v217_v49, %v221_v45  ;;  %v230_v55 = vrot.slane %v217_v49, %v229_v46  ;;  %v226_v58 = vrot.slane %v217_v49, %v225_v50 }
   0xc   :  { %153 = vmatprep.mubr.bf16.mxu0 %v774_v1  ;;  %206 = vmatprep.mubr.bf16.mxu1 %v774_v1  ;;  %v234_v59 = vrot.slane %v217_v49, %v233_v51 }
   0xd   :  { %324 = vmatpush1.bf16.msra.mxu0 %v758_v11  ;;  %377 = vmatpush1.bf16.msra.mxu1 %v761_v13 }
   0xe   :  { %325 = vmatprep.subr.bf16.mxu0 %v766_v14  ;;  %378 = vmatprep.subr.bf16.mxu1 %v769_v15 }
   0xf   :  { %438 = vperm.xlu0 %742, %v420_v21   ;;  %428 = vperm.xlu1 %743, %v418_v22  }
  0x11   :  { %326 = vmatpush1.bf16.msra.mxu0 %v764_v16  ;;  %379 = vmatpush1.bf16.msra.mxu1 %v767_v17 }
  0x13   :  { %702 = vmatmul.mubr.msk.bf16.gmra.mxu0 %vm104_vm0, %v757_v19  ;;  %704 = vmatmul.mubr.msk.bf16.gmra.mxu1 %vm104_vm0, %v757_v19 }
  0x14   :  { %343 = vmatprep.mubr.bf16.mxu0 %v774_v1  ;;  %396 = vmatprep.mubr.bf16.mxu1 %v774_v1 }
  0x15   :  { %491 = vperm.xlu0 %742, %v485_v23   ;;  %496 = vperm.xlu1 %743, %v486_v24  }
  0x19   :  { %501 = vperm.xlu0 %742, %v487_v26   ;;  %506 = vperm.xlu1 %743, %v488_v27  }
  0x1b   :  { %715 = vmatmul.mubr.msk.bf16.vlgmr.msra.gmra.mxu0 %vm104_vm0, %v770_v25  ;;  %717 = vmatmul.mubr.msk.bf16.vlgmr.msra.gmra.mxu1 %vm104_vm0, %v770_v25 }
  0x1c   :  { %353 = vmatprep.mubr.bf16.mxu0 %v774_v1  ;;  %406 = vmatprep.mubr.bf16.mxu1 %v774_v1 }
  0x23   :  { %716 = vmatmul.mubr.msk.bf16.gmra.mxu0 %vm104_vm0, %v771_v28  ;;  %718 = vmatmul.mubr.msk.bf16.gmra.mxu1 %vm104_vm0, %v771_v28 }
  0x24   :  { %557 = vmatprep.mubr.bf16.mxu0 %v774_v1  ;;  %610 = vmatprep.mubr.bf16.mxu1 %v774_v1 }
  0x85   :  { %v434_v7 = vpop.permute.xlu0 %433  ;;  %v424_v8 = vpop.permute.xlu1 %423 }
  0x8a   :  { %v439_v35 = vpop.permute.xlu0 %438 }
  0xcb   :  { %v145_v29 = vpop.f32.mrf.mxu0  ;;  %v198_v30 = vpop.f32.mrf.mxu1 }
  0xcc   :  { %v239_v62 = vmul.f32 %v222_v54, %v145_v29  ;;  %v241_v63 = vmul.f32 %v230_v55, %v198_v30 }
  0xcd   :  { %v147_v31 = vpop.f32.mrf.mxu0  ;;  %v200_v32 = vpop.f32.mrf.mxu1 }
  0xce   :  { %v240_v3 = vmul.f32 %v226_v58, %v147_v31  ;;  %v242_v4 = vmul.f32 %v234_v59, %v200_v32 }
  0xcf   :  { %v149_v33 = vpop.f32.mrf.mxu0  ;;  %v202_v34 = vpop.f32.mrf.mxu1 }
  0xd0   :  { %v243_v5 = vmul.f32 %v222_v54, %v149_v33  ;;  %v245_v6 = vmul.f32 %v230_v55, %v202_v34 }
  0xd1   :  { %v151_v36 = vpop.f32.mrf.mxu0  ;;  %v204_v37 = vpop.f32.mrf.mxu1 }
  0xd2   :  { %v244_v9 = vmul.f32 %v226_v58, %v151_v36  ;;  %v246_v10 = vmul.f32 %v234_v59, %v204_v37 }
  0xd3   :  { %v155_v38 = vpop.f32.mrf.mxu0  ;;  %v208_v39 = vpop.f32.mrf.mxu1 }
  0xd4   :  { %v247_v11 = vmul.f32 %v222_v54, %v155_v38  ;;  %v249_v12 = vmul.f32 %v230_v55, %v208_v39  ;;  %v429_v38 = vpop.permute.xlu1 %428 }
  0xd5   :  { %v157_v41 = vpop.f32.mrf.mxu0  ;;  %v210_v42 = vpop.f32.mrf.mxu1 }
  0xd6   :  { %v248_v15 = vmul.f32 %v226_v58, %v157_v41  ;;  %v250_v16 = vmul.f32 %v234_v59, %v210_v42 }
  0xd7   :  { %v159_v43 = vpop.f32.mrf.mxu0  ;;  %v212_v44 = vpop.f32.mrf.mxu1 }
  0xd8   :  { %v251_v17 = vmul.f32 %v222_v54, %v159_v43  ;;  %v253_v18 = vmul.f32 %v230_v55, %v212_v44 }
  0xd9   :  { %v161_v47 = vpop.f32.mrf.mxu0  ;;  %v214_v48 = vpop.f32.mrf.mxu1 }
  0xda   :  { %v252_v19 = vmul.f32 %v226_v58, %v161_v47  ;;  %v254_v20 = vmul.f32 %v234_v59, %v214_v48 }
  0xdb   :  { %v345_v52 = vpop.f32.mrf.mxu0  ;;  %v398_v53 = vpop.f32.mrf.mxu1 }
  0xdc   :  { %v346_v25 = vadd.f32 %v345_v52, %v239_v62  ;;  %v399_v26 = vadd.f32 %v398_v53, %v241_v63 }
  0xdd   :  { %v347_v56 = vpop.f32.mrf.mxu0  ;;  %v400_v57 = vpop.f32.mrf.mxu1 }
  0xde   :  { %v348_v27 = vadd.f32 %v347_v56, %v240_v3  ;;  %v401_v28 = vadd.f32 %v400_v57, %v242_v4  ;;  %v441_v4 = vadd.f32 %v424_v8, %v346_v25 }
  0xdf   :  { %v349_v60 = vpop.f32.mrf.mxu0  ;;  %v402_v61 = vpop.f32.mrf.mxu1 }
  0xe0   :  { %v350_v36 = vadd.f32 %v349_v60, %v243_v5  ;;  %v403_v37 = vadd.f32 %v402_v61, %v245_v6  ;;  %v442_v51 = vadd.f32 %v424_v8, %v348_v27  ;;  %v444_v52 = vadd.f32 %v424_v8, %v401_v28 }
  0xe1   :  { %v351_v0 = vpop.f32.mrf.mxu0  ;;  %v404_v2 = vpop.f32.mrf.mxu1  ;;  %v443_v5 = vadd.f32 %v424_v8, %v399_v26 }
  0xe2   :  { %v352_v21 = vadd.f32 %v351_v0, %v244_v9  ;;  %v405_v22 = vadd.f32 %v404_v2, %v246_v10  ;;  %v445_v55 = vadd.f32 %v429_v38, %v350_v36  ;;  %v447_v56 = vadd.f32 %v429_v38, %v403_v37  ;;  %v492_v26 = vpop.permute.xlu0 %491 }
  0xe3   :  { %v355_v13 = vpop.f32.mrf.mxu0  ;;  %v408_v14 = vpop.f32.mrf.mxu1  ;;  %v458_v10 = vmax.f32 %v442_v51, 0.0 }
  0xe4   :  { %v356_v29 = vadd.f32 %v355_v13, %v247_v11  ;;  %v409_v30 = vadd.f32 %v408_v14, %v249_v12  ;;  %v446_v41 = vadd.f32 %v429_v38, %v352_v21  ;;  %v448_v42 = vadd.f32 %v429_v38, %v405_v22  ;;  %v772_v22 = vld [vmem:[%s969_s6] sm:$0xff]  }
  0xe5   :  { %v357_v23 = vpop.f32.mrf.mxu0  ;;  %v410_v24 = vpop.f32.mrf.mxu1  ;;  %v460_v11 = vmax.f32 %v444_v52, 0.0  ;;  %v461_v13 = vmax.f32 %v445_v55, 0.0  ;;  %v463_v14 = vmax.f32 %v447_v56, 0.0 }
  0xe6   :  { %v358_v31 = vadd.f32 %v357_v23, %v248_v15  ;;  %v411_v32 = vadd.f32 %v410_v24, %v250_v16  ;;  %v449_v53 = vadd.f32 %v434_v7, %v356_v29  ;;  %v451_v54 = vadd.f32 %v434_v7, %v409_v30  ;;  %v773_v23 = vld [vmem:[%s969_s6 + $0x8] sm:$0xff]  }
  0xe7   :  { %v359_v33 = vpop.f32.mrf.mxu0  ;;  %v412_v34 = vpop.f32.mrf.mxu1  ;;  %v462_v59 = vmax.f32 %v446_v41, 0.0  ;;  %v464_v60 = vmax.f32 %v448_v42, 0.0 }
  0xe8   :  { %v360_v39 = vadd.f32 %v359_v33, %v251_v17  ;;  %v413_v40 = vadd.f32 %v412_v34, %v253_v18  ;;  %v450_v43 = vadd.f32 %v434_v7, %v358_v31  ;;  %v452_v44 = vadd.f32 %v434_v7, %v411_v32 }
  0xe9   :  { %v361_v45 = vpop.f32.mrf.mxu0  ;;  %v414_v46 = vpop.f32.mrf.mxu1  ;;  %v465_v6 = vmax.f32 %v449_v53, 0.0  ;;  %v467_v9 = vmax.f32 %v451_v54, 0.0  ;;  %v478_v17 = vpack.c.bf16 %v462_v59, %v458_v10  ;;  %v480_v18 = vpack.c.bf16 %v464_v60, %v460_v11 }
  0xea   :  { %v453_v47 = vadd.f32 %v439_v35, %v360_v39  ;;  %v455_v48 = vadd.f32 %v439_v35, %v413_v40  ;;  %v362_v49 = vadd.f32 %v361_v45, %v252_v19  ;;  %v415_v50 = vadd.f32 %v414_v46, %v254_v20  ;;  %v502_v45 = vpop.permute.xlu0 %501 }
  0xeb   :  { %v466_v63 = vmax.f32 %v450_v43, 0.0  ;;  %v468_v0 = vmax.f32 %v452_v44, 0.0  ;;  %v457_v19 = vmax.f32 %v441_v4, 0.0  ;;  %v459_v20 = vmax.f32 %v443_v5, 0.0 }
  0xec   :  { %v454_v57 = vadd.f32 %v439_v35, %v362_v49  ;;  %v456_v58 = vadd.f32 %v439_v35, %v415_v50  ;;  %v469_v61 = vmax.f32 %v453_v47, 0.0  ;;  %v471_v62 = vmax.f32 %v455_v48, 0.0 }
  0xed   :  { %v477_v8 = vpack.c.bf16 %v461_v13, %v457_v19  ;;  %v479_v21 = vpack.c.bf16 %v463_v14, %v459_v20 }
  0xee   :  { %v470_v2 = vmax.f32 %v454_v57, 0.0  ;;  %v472_v3 = vmax.f32 %v456_v58, 0.0  ;;  %v481_v15 = vpack.c.bf16 %v469_v61, %v465_v6  ;;  %v483_v16 = vpack.c.bf16 %v471_v62, %v467_v9 }
  0xf0   :  { %v482_v12 = vpack.c.bf16 %v470_v2, %v466_v63  ;;  %v484_v7 = vpack.c.bf16 %v472_v3, %v468_v0 }
  0xf2   :  { %537 = vmatprep.subr.bf16.mxu0 %v482_v12  ;;  %590 = vmatprep.subr.bf16.mxu1 %v484_v7 }
  0xf3   :  { %538 = vmatpush1.bf16.msra.mxu0 %v481_v15  ;;  %591 = vmatpush1.bf16.msra.mxu1 %v483_v16 }
  0xf4   :  { %539 = vmatprep.subr.bf16.mxu0 %v478_v17  ;;  %592 = vmatprep.subr.bf16.mxu1 %v480_v18 }
  0xf7   :  { %540 = vmatpush1.bf16.msra.mxu0 %v477_v8  ;;  %593 = vmatpush1.bf16.msra.mxu1 %v479_v21 }
  0xfa   :  { %721 = vmatmul.mubr.msk.bf16.vlgmr.msra.gmra.mxu0 %vm104_vm0, %v772_v22  ;;  %723 = vmatmul.mubr.msk.bf16.vlgmr.msra.gmra.mxu1 %vm104_vm0, %v772_v22 }
  0xfb   :  { %567 = vmatprep.mubr.bf16.mxu0 %v774_v1  ;;  %620 = vmatprep.mubr.bf16.mxu1 %v774_v1  ;;  %v497_v1 = vpop.permute.xlu1 %496 }
  0xff   :  { %v507_v56 = vpop.permute.xlu1 %506 }
 0x102   :  { %722 = vmatmul.mubr.msk.bf16.gmra.mxu0 %vm104_vm0, %v773_v23  ;;  %724 = vmatmul.mubr.msk.bf16.gmra.mxu1 %vm104_vm0, %v773_v23 }
 0x1ba   :  { %v559_v24 = vpop.f32.mrf.mxu0  ;;  %v612_v25 = vpop.f32.mrf.mxu1 }
 0x1bb   :  { %v560_v29 = vadd.f32 %v559_v24, %v492_v26  ;;  %v613_v30 = vadd.f32 %v612_v25, %v492_v26 }
 0x1bc   :  { %v561_v27 = vpop.f32.mrf.mxu0  ;;  %v614_v28 = vpop.f32.mrf.mxu1 }
 0x1bd   :  { %v562_v31 = vadd.f32 %v561_v27, %v492_v26  ;;  %v615_v32 = vadd.f32 %v614_v28, %v492_v26 }
 0x1be   :  { %v563_v33 = vpop.f32.mrf.mxu0  ;;  %v616_v34 = vpop.f32.mrf.mxu1 }
 0x1bf   :  { %v733_v35 = vpack.c.bf16 %v562_v31, %v560_v29  ;;  %v734_v36 = vpack.c.bf16 %v615_v32, %v613_v30  ;;  %v564_v39 = vadd.f32 %v563_v33, %v497_v1  ;;  %v617_v40 = vadd.f32 %v616_v34, %v497_v1 }
 0x1c0   :  { %v565_v37 = vpop.f32.mrf.mxu0  ;;  %v618_v38 = vpop.f32.mrf.mxu1 }
 0x1c1   :  { %679 = vst [vmem:[%s971_s8] sm:$0xff] %v733_v35  ;;  %680 = vst [vmem:[%s971_s8 + $0x8] sm:$0xff] %v734_v36  ;;  %v566_v41 = vadd.f32 %v565_v37, %v497_v1  ;;  %v619_v42 = vadd.f32 %v618_v38, %v497_v1 }
 0x1c2   :  { %v569_v43 = vpop.f32.mrf.mxu0  ;;  %v622_v44 = vpop.f32.mrf.mxu1 }
 0x1c3   :  { %v735_v46 = vpack.c.bf16 %v566_v41, %v564_v39  ;;  %v736_v47 = vpack.c.bf16 %v619_v42, %v617_v40  ;;  %v570_v50 = vadd.f32 %v569_v43, %v502_v45  ;;  %v623_v51 = vadd.f32 %v622_v44, %v502_v45 }
 0x1c4   :  { %v571_v48 = vpop.f32.mrf.mxu0  ;;  %v624_v49 = vpop.f32.mrf.mxu1 }
 0x1c5   :  { %681 = vst [vmem:[%s971_s8 + $0x10] sm:$0xff] %v735_v46  ;;  %682 = vst [vmem:[%s971_s8 + $0x18] sm:$0xff] %v736_v47  ;;  %v572_v52 = vadd.f32 %v571_v48, %v502_v45  ;;  %v625_v53 = vadd.f32 %v624_v49, %v502_v45 }
 0x1c6   :  { %v573_v54 = vpop.f32.mrf.mxu0  ;;  %v626_v55 = vpop.f32.mrf.mxu1 }
 0x1c7   :  { %v737_v57 = vpack.c.bf16 %v572_v52, %v570_v50  ;;  %v738_v58 = vpack.c.bf16 %v625_v53, %v623_v51  ;;  %v574_v61 = vadd.f32 %v573_v54, %v507_v56  ;;  %v627_v62 = vadd.f32 %v626_v55, %v507_v56 }
 0x1c8   :  { %v575_v59 = vpop.f32.mrf.mxu0  ;;  %v628_v60 = vpop.f32.mrf.mxu1 }
 0x1c9   :  { %683 = vst [vmem:[%s971_s8 + $0x20] sm:$0xff] %v737_v57  ;;  %684 = vst [vmem:[%s971_s8 + $0x28] sm:$0xff] %v738_v58  ;;  %v576_v63 = vadd.f32 %v575_v59, %v507_v56  ;;  %v629_v0 = vadd.f32 %v628_v60, %v507_v56 }
 0x1cb   :  { %v739_v2 = vpack.c.bf16 %v576_v63, %v574_v61  ;;  %v740_v3 = vpack.c.bf16 %v629_v0, %v627_v62 }
 0x1cd   :  { %685 = vst [vmem:[%s971_s8 + $0x30] sm:$0xff] %v739_v2  ;;  %686 = vst [vmem:[%s971_s8 + $0x38] sm:$0xff] %v740_v3 }

// kernel: neuralpcg_forward.8
= control target key start
LH: loop header
LB: loop body
LE: loop exit
PB: predicated region body
PF: predicated region fallthrough
CT: control target
= control target key end

     0   :  { %v957_v1 = vmov 0   ;;  %vm107_vm0 = vcmask 261120   ;;  %s1186_s1 = inlined_call_operand.vmem [shape: bf16[32,512], index: 1, kind: input, shape index: {}]   ;;  %s1187_s4 = inlined_call_operand.vmem [shape: bf16[32,32], index: 4, kind: input, shape index: {}]   ;;  %s1188_s0 = inlined_call_operand.vmem [shape: bf16[32,512], index: 0, kind: input, shape index: {}]   ;;  %s1189_s3 = inlined_call_operand.vmem [shape: bf16[32,32], index: 3, kind: input, shape index: {}]   ;;  %s1190_s2 = inlined_call_operand.vmem [shape: bf16[32,512], index: 2, kind: input, shape index: {}]   ;;  %s1191_s5 = inlined_call_operand.vmem [shape: bf16[32,32], index: 5, kind: input, shape index: {}]   ;;  %s1192_s6 = inlined_call_operand.vmem [shape: f32[32,1], index: 6, kind: input, shape index: {}]   ;;  %s1193_s8 = inlined_call_operand.vmem [shape: f32[32,1], index: 8, kind: input, shape index: {}]   ;;  %s1194_s7 = inlined_call_operand.vmem [shape: bf16[32,32], index: 7, kind: input, shape index: {}]   ;;  %s1195_s9 = inlined_call_operand.vmem [shape: bf16[32,512], index: 9, kind: output, shape index: {}]  }
   0x1   :  { %v913_v0 = vld [vmem:[%s1186_s1 + $0x24] ss:$16 sps:$4 sm:$0xff]   ;;  %146 = vmatprep.mubr.bf16.mxu0 %v957_v1  ;;  %199 = vmatprep.mubr.bf16.mxu1 %v957_v1  ;;  %v915_v2 = vld [vmem:[%s1186_s1 + $0x2c] ss:$16 sps:$4 sm:$0xff]   ;;  %v917_v3 = vld [vmem:[%s1186_s1 + $0x20] ss:$16 sps:$4 sm:$0xff]  }
   0x2   :  { %911 = vset.pattern.permute.xlu0 %v957_v1  ;;  %912 = vset.pattern.permute.xlu1 %v957_v1  ;;  %v918_v4 = vld [vmem:[%s1186_s1 + $0x28] ss:$16 sps:$4 sm:$0xff]   ;;  %v919_v5 = vld [vmem:[%s1186_s1 + $0x4] ss:$16 sps:$4 sm:$0xff]   ;;  %v921_v6 = vld [vmem:[%s1186_s1 + $0xc] ss:$16 sps:$4 sm:$0xff]  }
   0x3   :  { %126 = vmatprep.subr.bf16.mxu0 %v913_v0  ;;  %179 = vmatprep.subr.bf16.mxu1 %v915_v2  ;;  %v923_v7 = vld [vmem:[%s1186_s1] ss:$16 sps:$4 sm:$0xff]   ;;  %v924_v8 = vld [vmem:[%s1186_s1 + $0x8] ss:$16 sps:$4 sm:$0xff]   ;;  %v929_v10 = vld [vmem:[%s1188_s0 + $0x24] ss:$16 sps:$4 sm:$0xff]  }
   0x4   :  { %127 = vmatpush1.bf16.msra.mxu0 %v917_v3  ;;  %180 = vmatpush1.bf16.msra.mxu1 %v918_v4  ;;  %v925_v9 = vld [vmem:[%s1187_s4] sm:$0xff]   ;;  %v932_v12 = vld [vmem:[%s1188_s0 + $0x2c] ss:$16 sps:$4 sm:$0xff]   ;;  %v930_v13 = vld [vmem:[%s1188_s0 + $0x28] ss:$16 sps:$4 sm:$0xff]  }
   0x5   :  { %128 = vmatprep.subr.bf16.mxu0 %v919_v5  ;;  %181 = vmatprep.subr.bf16.mxu1 %v921_v6  ;;  %v927_v11 = vld [vmem:[%s1188_s0 + $0x20] ss:$16 sps:$4 sm:$0xff]   ;;  %v935_v14 = vld [vmem:[%s1188_s0 + $0x4] ss:$16 sps:$4 sm:$0xff]   ;;  %v938_v15 = vld [vmem:[%s1188_s0 + $0xc] ss:$16 sps:$4 sm:$0xff]  }
   0x6   :  { %v933_v16 = vld [vmem:[%s1188_s0] ss:$16 sps:$4 sm:$0xff]   ;;  %v936_v17 = vld [vmem:[%s1188_s0 + $0x8] ss:$16 sps:$4 sm:$0xff]   ;;  %v943_v19 = vld [vmem:[%s1190_s2 + $0x24] ss:$16 sps:$4 sm:$0xff]  }
   0x7   :  { %v926_v18 = vld [vmem:[%s1187_s4 + $0x8] sm:$0xff]   ;;  %v574_v21 = vld [vmem:[%s1192_s6 + $0x10] sm:$0xff]  ;;  %v572_v22 = vld [vmem:[%s1192_s6] sm:$0xff] }
   0x8   :  { %129 = vmatpush1.bf16.msra.mxu0 %v923_v7  ;;  %182 = vmatpush1.bf16.msra.mxu1 %v924_v8  ;;  %v946_v20 = vld [vmem:[%s1190_s2 + $0x2c] ss:$16 sps:$4 sm:$0xff]   ;;  %v939_v23 = vld [vmem:[%s1189_s3] sm:$0xff]   ;;  %v944_v25 = vld [vmem:[%s1190_s2 + $0x28] ss:$16 sps:$4 sm:$0xff]  }
   0x9   :  { %288 = vmatprep.subr.bf16.mxu0 %v929_v10  ;;  %341 = vmatprep.subr.bf16.mxu1 %v932_v12  ;;  %v941_v24 = vld [vmem:[%s1190_s2 + $0x20] ss:$16 sps:$4 sm:$0xff]   ;;  %v949_v26 = vld [vmem:[%s1190_s2 + $0x4] ss:$16 sps:$4 sm:$0xff]   ;;  %v952_v27 = vld [vmem:[%s1190_s2 + $0xc] ss:$16 sps:$4 sm:$0xff]  }
   0xa   :  { %588 = vperm.xlu0 %911, %v574_v21   ;;  %578 = vperm.xlu1 %912, %v572_v22   ;;  %v575_v28 = vld [vmem:[%s1192_s6 + $0x18] sm:$0xff]  ;;  %v573_v29 = vld [vmem:[%s1192_s6 + $0x8] sm:$0xff]  ;;  %v947_v30 = vld [vmem:[%s1190_s2] ss:$16 sps:$4 sm:$0xff]  }
   0xb   :  { %856 = vmatmul.mubr.msk.bf16.vlgmr.msra.gmra.mxu0 %vm107_vm0, %v925_v9  ;;  %858 = vmatmul.mubr.msk.bf16.vlgmr.msra.gmra.mxu1 %vm107_vm0, %v925_v9  ;;  %v950_v31 = vld [vmem:[%s1190_s2 + $0x8] ss:$16 sps:$4 sm:$0xff]   ;;  %v640_v33 = vld [vmem:[%s1193_s8] sm:$0xff]  ;;  %v642_v35 = vld [vmem:[%s1193_s8 + $0x10] sm:$0xff] }
   0xc   :  { %156 = vmatprep.mubr.bf16.mxu0 %v957_v1  ;;  %209 = vmatprep.mubr.bf16.mxu1 %v957_v1  ;;  %v940_v32 = vld [vmem:[%s1189_s3 + $0x8] sm:$0xff]   ;;  %v643_v36 = vld [vmem:[%s1193_s8 + $0x18] sm:$0xff]  ;;  %v953_v37 = vld [vmem:[%s1191_s5] sm:$0xff]  }
   0xd   :  { %289 = vmatpush1.bf16.msra.mxu0 %v927_v11  ;;  %342 = vmatpush1.bf16.msra.mxu1 %v930_v13  ;;  %v641_v34 = vld [vmem:[%s1193_s8 + $0x8] sm:$0xff] }
   0xe   :  { %290 = vmatprep.subr.bf16.mxu0 %v935_v14  ;;  %343 = vmatprep.subr.bf16.mxu1 %v938_v15  ;;  %v954_v38 = vld [vmem:[%s1191_s5 + $0x8] sm:$0xff]  }
   0xf   :  { %593 = vperm.xlu0 %911, %v575_v28   ;;  %583 = vperm.xlu1 %912, %v573_v29  }
  0x11   :  { %291 = vmatpush1.bf16.msra.mxu0 %v933_v16  ;;  %344 = vmatpush1.bf16.msra.mxu1 %v936_v17 }
  0x12   :  { %462 = vmatprep.subr.bf16.mxu0 %v943_v19  ;;  %515 = vmatprep.subr.bf16.mxu1 %v946_v20 }
  0x13   :  { %857 = vmatmul.mubr.msk.bf16.gmra.mxu0 %vm107_vm0, %v926_v18  ;;  %859 = vmatmul.mubr.msk.bf16.gmra.mxu1 %vm107_vm0, %v926_v18 }
  0x14   :  { %308 = vmatprep.mubr.bf16.mxu0 %v957_v1  ;;  %361 = vmatprep.mubr.bf16.mxu1 %v957_v1 }
  0x15   :  { %646 = vperm.xlu0 %911, %v640_v33   ;;  %651 = vperm.xlu1 %912, %v641_v34  }
  0x19   :  { %656 = vperm.xlu0 %911, %v642_v35   ;;  %661 = vperm.xlu1 %912, %v643_v36  }
  0x1b   :  { %870 = vmatmul.mubr.msk.bf16.vlgmr.msra.gmra.mxu0 %vm107_vm0, %v939_v23  ;;  %872 = vmatmul.mubr.msk.bf16.vlgmr.msra.gmra.mxu1 %vm107_vm0, %v939_v23 }
  0x1c   :  { %318 = vmatprep.mubr.bf16.mxu0 %v957_v1  ;;  %371 = vmatprep.mubr.bf16.mxu1 %v957_v1 }
  0x1d   :  { %463 = vmatpush1.bf16.msra.mxu0 %v941_v24  ;;  %516 = vmatpush1.bf16.msra.mxu1 %v944_v25 }
  0x1e   :  { %464 = vmatprep.subr.bf16.mxu0 %v949_v26  ;;  %517 = vmatprep.subr.bf16.mxu1 %v952_v27 }
  0x21   :  { %465 = vmatpush1.bf16.msra.mxu0 %v947_v30  ;;  %518 = vmatpush1.bf16.msra.mxu1 %v950_v31 }
  0x23   :  { %871 = vmatmul.mubr.msk.bf16.gmra.mxu0 %vm107_vm0, %v940_v32  ;;  %873 = vmatmul.mubr.msk.bf16.gmra.mxu1 %vm107_vm0, %v940_v32 }
  0x24   :  { %482 = vmatprep.mubr.bf16.mxu0 %v957_v1  ;;  %535 = vmatprep.mubr.bf16.mxu1 %v957_v1 }
  0x2b   :  { %884 = vmatmul.mubr.msk.bf16.vlgmr.msra.gmra.mxu0 %vm107_vm0, %v953_v37  ;;  %886 = vmatmul.mubr.msk.bf16.vlgmr.msra.gmra.mxu1 %vm107_vm0, %v953_v37 }
  0x2c   :  { %492 = vmatprep.mubr.bf16.mxu0 %v957_v1  ;;  %545 = vmatprep.mubr.bf16.mxu1 %v957_v1 }
  0x33   :  { %885 = vmatmul.mubr.msk.bf16.gmra.mxu0 %vm107_vm0, %v954_v38  ;;  %887 = vmatmul.mubr.msk.bf16.gmra.mxu1 %vm107_vm0, %v954_v38 }
  0x34   :  { %712 = vmatprep.mubr.bf16.mxu0 %v957_v1  ;;  %765 = vmatprep.mubr.bf16.mxu1 %v957_v1 }
  0x85   :  { %v589_v22 = vpop.permute.xlu0 %588  ;;  %v579_v23 = vpop.permute.xlu1 %578 }
  0xcb   :  { %v148_v39 = vpop.f32.mrf.mxu0  ;;  %v201_v40 = vpop.f32.mrf.mxu1 }
  0xcd   :  { %v150_v41 = vpop.f32.mrf.mxu0  ;;  %v203_v42 = vpop.f32.mrf.mxu1 }
  0xcf   :  { %v152_v43 = vpop.f32.mrf.mxu0  ;;  %v205_v44 = vpop.f32.mrf.mxu1 }
  0xd1   :  { %v154_v45 = vpop.f32.mrf.mxu0  ;;  %v207_v46 = vpop.f32.mrf.mxu1 }
  0xd3   :  { %v158_v47 = vpop.f32.mrf.mxu0  ;;  %v211_v48 = vpop.f32.mrf.mxu1 }
  0xd5   :  { %v160_v49 = vpop.f32.mrf.mxu0  ;;  %v213_v50 = vpop.f32.mrf.mxu1 }
  0xd7   :  { %v162_v51 = vpop.f32.mrf.mxu0  ;;  %v215_v52 = vpop.f32.mrf.mxu1 }
  0xd9   :  { %v164_v53 = vpop.f32.mrf.mxu0  ;;  %v217_v54 = vpop.f32.mrf.mxu1 }
  0xdb   :  { %v310_v55 = vpop.f32.mrf.mxu0  ;;  %v363_v56 = vpop.f32.mrf.mxu1 }
  0xdc   :  { %v311_v14 = vadd.f32 %v310_v55, %v148_v39  ;;  %v364_v15 = vadd.f32 %v363_v56, %v201_v40 }
  0xdd   :  { %v312_v57 = vpop.f32.mrf.mxu0  ;;  %v365_v58 = vpop.f32.mrf.mxu1 }
  0xde   :  { %v313_v18 = vadd.f32 %v312_v57, %v150_v41  ;;  %v366_v19 = vadd.f32 %v365_v58, %v203_v42 }
  0xdf   :  { %v314_v59 = vpop.f32.mrf.mxu0  ;;  %v367_v60 = vpop.f32.mrf.mxu1 }
  0xe0   :  { %v315_v20 = vadd.f32 %v314_v59, %v152_v43  ;;  %v368_v21 = vadd.f32 %v367_v60, %v205_v44 }
  0xe1   :  { %v316_v61 = vpop.f32.mrf.mxu0  ;;  %v369_v62 = vpop.f32.mrf.mxu1 }
  0xe2   :  { %v317_v24 = vadd.f32 %v316_v61, %v154_v45  ;;  %v370_v25 = vadd.f32 %v369_v62, %v207_v46 }
  0xe3   :  { %v320_v63 = vpop.f32.mrf.mxu0  ;;  %v373_v0 = vpop.f32.mrf.mxu1 }
  0xe4   :  { %v321_v26 = vadd.f32 %v320_v63, %v158_v47  ;;  %v374_v27 = vadd.f32 %v373_v0, %v211_v48 }
  0xe5   :  { %v322_v2 = vpop.f32.mrf.mxu0  ;;  %v375_v3 = vpop.f32.mrf.mxu1 }
  0xe6   :  { %v323_v30 = vadd.f32 %v322_v2, %v160_v49  ;;  %v376_v31 = vadd.f32 %v375_v3, %v213_v50  ;;  %v594_v49 = vpop.permute.xlu0 %593 }
  0xe7   :  { %v324_v4 = vpop.f32.mrf.mxu0  ;;  %v377_v5 = vpop.f32.mrf.mxu1 }
  0xe8   :  { %v325_v32 = vadd.f32 %v324_v4, %v162_v51  ;;  %v378_v33 = vadd.f32 %v377_v5, %v215_v52  ;;  %v584_v52 = vpop.permute.xlu1 %583 }
  0xe9   :  { %v326_v6 = vpop.f32.mrf.mxu0  ;;  %v379_v7 = vpop.f32.mrf.mxu1 }
  0xea   :  { %v327_v34 = vadd.f32 %v326_v6, %v164_v53  ;;  %v380_v35 = vadd.f32 %v379_v7, %v217_v54 }
  0xeb   :  { %v484_v8 = vpop.f32.mrf.mxu0  ;;  %v537_v9 = vpop.f32.mrf.mxu1 }
  0xec   :  { %v556_v40 = vadd.f32 %v484_v8, %v311_v14  ;;  %v558_v41 = vadd.f32 %v537_v9, %v364_v15 }
  0xed   :  { %v486_v10 = vpop.f32.mrf.mxu0  ;;  %v539_v11 = vpop.f32.mrf.mxu1 }
  0xee   :  { %v557_v42 = vadd.f32 %v486_v10, %v313_v18  ;;  %v559_v43 = vadd.f32 %v539_v11, %v366_v19  ;;  %v596_v19 = vadd.f32 %v579_v23, %v556_v40 }
  0xef   :  { %v488_v12 = vpop.f32.mrf.mxu0  ;;  %v541_v13 = vpop.f32.mrf.mxu1 }
  0xf0   :  { %v560_v50 = vadd.f32 %v488_v12, %v315_v20  ;;  %v562_v51 = vadd.f32 %v541_v13, %v368_v21  ;;  %v597_v3 = vadd.f32 %v579_v23, %v557_v42  ;;  %v599_v4 = vadd.f32 %v579_v23, %v559_v43 }
  0xf1   :  { %v490_v16 = vpop.f32.mrf.mxu0  ;;  %v543_v17 = vpop.f32.mrf.mxu1  ;;  %v598_v20 = vadd.f32 %v579_v23, %v558_v41 }
  0xf2   :  { %v561_v36 = vadd.f32 %v490_v16, %v317_v24  ;;  %v563_v37 = vadd.f32 %v543_v17, %v370_v25  ;;  %v600_v7 = vadd.f32 %v584_v52, %v560_v50  ;;  %v602_v8 = vadd.f32 %v584_v52, %v562_v51  ;;  %v647_v41 = vpop.permute.xlu0 %646 }
  0xf3   :  { %v494_v28 = vpop.f32.mrf.mxu0  ;;  %v547_v29 = vpop.f32.mrf.mxu1  ;;  %v613_v25 = vmax.f32 %v597_v3, 0.0 }
  0xf4   :  { %v564_v44 = vadd.f32 %v494_v28, %v321_v26  ;;  %v566_v45 = vadd.f32 %v547_v29, %v374_v27  ;;  %v601_v56 = vadd.f32 %v584_v52, %v561_v36  ;;  %v603_v57 = vadd.f32 %v584_v52, %v563_v37  ;;  %v955_v37 = vld [vmem:[%s1194_s7] sm:$0xff]  }
  0xf5   :  { %v496_v38 = vpop.f32.mrf.mxu0  ;;  %v549_v39 = vpop.f32.mrf.mxu1  ;;  %v615_v26 = vmax.f32 %v599_v4, 0.0  ;;  %v616_v28 = vmax.f32 %v600_v7, 0.0  ;;  %v618_v29 = vmax.f32 %v602_v8, 0.0 }
  0xf6   :  { %v565_v46 = vadd.f32 %v496_v38, %v323_v30  ;;  %v567_v47 = vadd.f32 %v549_v39, %v376_v31  ;;  %v604_v5 = vadd.f32 %v589_v22, %v564_v44  ;;  %v606_v6 = vadd.f32 %v589_v22, %v566_v45  ;;  %v956_v38 = vld [vmem:[%s1194_s7 + $0x8] sm:$0xff]  }
  0xf7   :  { %v498_v48 = vpop.f32.mrf.mxu0  ;;  %v551_v55 = vpop.f32.mrf.mxu1  ;;  %v617_v11 = vmax.f32 %v601_v56, 0.0  ;;  %v619_v12 = vmax.f32 %v603_v57, 0.0 }
  0xf8   :  { %v568_v53 = vadd.f32 %v498_v48, %v325_v32  ;;  %v570_v54 = vadd.f32 %v551_v55, %v378_v33  ;;  %v605_v58 = vadd.f32 %v589_v22, %v565_v46  ;;  %v607_v59 = vadd.f32 %v589_v22, %v567_v47 }
  0xf9   :  { %v500_v60 = vpop.f32.mrf.mxu0  ;;  %v553_v61 = vpop.f32.mrf.mxu1  ;;  %v620_v21 = vmax.f32 %v604_v5, 0.0  ;;  %v622_v24 = vmax.f32 %v606_v6, 0.0  ;;  %v633_v32 = vpack.c.bf16 %v617_v11, %v613_v25  ;;  %v635_v33 = vpack.c.bf16 %v619_v12, %v615_v26 }
  0xfa   :  { %v608_v62 = vadd.f32 %v594_v49, %v568_v53  ;;  %v610_v63 = vadd.f32 %v594_v49, %v570_v54  ;;  %v569_v0 = vadd.f32 %v500_v60, %v327_v34  ;;  %v571_v2 = vadd.f32 %v553_v61, %v380_v35  ;;  %v657_v60 = vpop.permute.xlu0 %656 }
  0xfb   :  { %v621_v15 = vmax.f32 %v605_v58, 0.0  ;;  %v623_v16 = vmax.f32 %v607_v59, 0.0  ;;  %v612_v34 = vmax.f32 %v596_v19, 0.0  ;;  %v614_v35 = vmax.f32 %v598_v20, 0.0 }
  0xfc   :  { %v609_v9 = vadd.f32 %v594_v49, %v569_v0  ;;  %v611_v10 = vadd.f32 %v594_v49, %v571_v2  ;;  %v624_v13 = vmax.f32 %v608_v62, 0.0  ;;  %v626_v14 = vmax.f32 %v610_v63, 0.0 }
  0xfd   :  { %v632_v23 = vpack.c.bf16 %v616_v28, %v612_v34  ;;  %v634_v36 = vpack.c.bf16 %v618_v29, %v614_v35 }
  0xfe   :  { %v625_v17 = vmax.f32 %v609_v9, 0.0  ;;  %v627_v18 = vmax.f32 %v611_v10, 0.0  ;;  %v636_v30 = vpack.c.bf16 %v624_v13, %v620_v21  ;;  %v638_v31 = vpack.c.bf16 %v626_v14, %v622_v24 }
 0x100   :  { %v637_v27 = vpack.c.bf16 %v625_v17, %v621_v15  ;;  %v639_v22 = vpack.c.bf16 %v627_v18, %v623_v16 }
 0x102   :  { %692 = vmatprep.subr.bf16.mxu0 %v637_v27  ;;  %745 = vmatprep.subr.bf16.mxu1 %v639_v22 }
 0x103   :  { %693 = vmatpush1.bf16.msra.mxu0 %v636_v30  ;;  %746 = vmatpush1.bf16.msra.mxu1 %v638_v31 }
 0x104   :  { %694 = vmatprep.subr.bf16.mxu0 %v633_v32  ;;  %747 = vmatprep.subr.bf16.mxu1 %v635_v33 }
 0x107   :  { %695 = vmatpush1.bf16.msra.mxu0 %v632_v23  ;;  %748 = vmatpush1.bf16.msra.mxu1 %v634_v36 }
 0x10a   :  { %890 = vmatmul.mubr.msk.bf16.vlgmr.msra.gmra.mxu0 %vm107_vm0, %v955_v37  ;;  %892 = vmatmul.mubr.msk.bf16.vlgmr.msra.gmra.mxu1 %vm107_vm0, %v955_v37 }
 0x10b   :  { %722 = vmatprep.mubr.bf16.mxu0 %v957_v1  ;;  %775 = vmatprep.mubr.bf16.mxu1 %v957_v1  ;;  %v652_v1 = vpop.permute.xlu1 %651 }
 0x10f   :  { %v662_v8 = vpop.permute.xlu1 %661 }
 0x112   :  { %891 = vmatmul.mubr.msk.bf16.gmra.mxu0 %vm107_vm0, %v956_v38  ;;  %893 = vmatmul.mubr.msk.bf16.gmra.mxu1 %vm107_vm0, %v956_v38 }
 0x1ca   :  { %v714_v39 = vpop.f32.mrf.mxu0  ;;  %v767_v40 = vpop.f32.mrf.mxu1 }
 0x1cb   :  { %v715_v44 = vadd.f32 %v714_v39, %v647_v41  ;;  %v768_v45 = vadd.f32 %v767_v40, %v647_v41 }
 0x1cc   :  { %v716_v42 = vpop.f32.mrf.mxu0  ;;  %v769_v43 = vpop.f32.mrf.mxu1 }
 0x1cd   :  { %v717_v46 = vadd.f32 %v716_v42, %v647_v41  ;;  %v770_v47 = vadd.f32 %v769_v43, %v647_v41 }
 0x1ce   :  { %v718_v48 = vpop.f32.mrf.mxu0  ;;  %v771_v55 = vpop.f32.mrf.mxu1 }
 0x1cf   :  { %v902_v49 = vpack.c.bf16 %v717_v46, %v715_v44  ;;  %v903_v50 = vpack.c.bf16 %v770_v47, %v768_v45  ;;  %v719_v53 = vadd.f32 %v718_v48, %v652_v1  ;;  %v772_v54 = vadd.f32 %v771_v55, %v652_v1 }
 0x1d0   :  { %v720_v51 = vpop.f32.mrf.mxu0  ;;  %v773_v52 = vpop.f32.mrf.mxu1 }
 0x1d1   :  { %834 = vst [vmem:[%s1195_s9] sm:$0xff] %v902_v49  ;;  %835 = vst [vmem:[%s1195_s9 + $0x8] sm:$0xff] %v903_v50  ;;  %v721_v56 = vadd.f32 %v720_v51, %v652_v1  ;;  %v774_v57 = vadd.f32 %v773_v52, %v652_v1 }
 0x1d2   :  { %v724_v58 = vpop.f32.mrf.mxu0  ;;  %v777_v59 = vpop.f32.mrf.mxu1 }
 0x1d3   :  { %v904_v61 = vpack.c.bf16 %v721_v56, %v719_v53  ;;  %v905_v62 = vpack.c.bf16 %v774_v57, %v772_v54  ;;  %v725_v2 = vadd.f32 %v724_v58, %v657_v60  ;;  %v778_v3 = vadd.f32 %v777_v59, %v657_v60 }
 0x1d4   :  { %v726_v63 = vpop.f32.mrf.mxu0  ;;  %v779_v0 = vpop.f32.mrf.mxu1 }
 0x1d5   :  { %836 = vst [vmem:[%s1195_s9 + $0x10] sm:$0xff] %v904_v61  ;;  %837 = vst [vmem:[%s1195_s9 + $0x18] sm:$0xff] %v905_v62  ;;  %v727_v4 = vadd.f32 %v726_v63, %v657_v60  ;;  %v780_v5 = vadd.f32 %v779_v0, %v657_v60 }
 0x1d6   :  { %v728_v6 = vpop.f32.mrf.mxu0  ;;  %v781_v7 = vpop.f32.mrf.mxu1 }
 0x1d7   :  { %v906_v9 = vpack.c.bf16 %v727_v4, %v725_v2  ;;  %v907_v10 = vpack.c.bf16 %v780_v5, %v778_v3  ;;  %v729_v13 = vadd.f32 %v728_v6, %v662_v8  ;;  %v782_v14 = vadd.f32 %v781_v7, %v662_v8 }
 0x1d8   :  { %v730_v11 = vpop.f32.mrf.mxu0  ;;  %v783_v12 = vpop.f32.mrf.mxu1 }
 0x1d9   :  { %838 = vst [vmem:[%s1195_s9 + $0x20] sm:$0xff] %v906_v9  ;;  %839 = vst [vmem:[%s1195_s9 + $0x28] sm:$0xff] %v907_v10  ;;  %v731_v15 = vadd.f32 %v730_v11, %v662_v8  ;;  %v784_v16 = vadd.f32 %v783_v12, %v662_v8 }
 0x1db   :  { %v908_v17 = vpack.c.bf16 %v731_v15, %v729_v13  ;;  %v909_v18 = vpack.c.bf16 %v784_v16, %v782_v14 }
 0x1dd   :  { %840 = vst [vmem:[%s1195_s9 + $0x30] sm:$0xff] %v908_v17  ;;  %841 = vst [vmem:[%s1195_s9 + $0x38] sm:$0xff] %v909_v18 }

// kernel: neuralpcg_forward.9
= control target key start
LH: loop header
LB: loop body
LE: loop exit
PB: predicated region body
PF: predicated region fallthrough
CT: control target
= control target key end

     0   :  { %v419_v1 = vmov 0   ;;  %vm115_vm0 = vcmask 261120   ;;  %s546_s0 = inlined_call_operand.vmem [shape: bf16[32,512], index: 0, kind: input, shape index: {}]   ;;  %s547_s6 = inlined_call_operand.<no memory space> [shape: f32[1,1], index: 6, kind: input, shape index: {}]   ;;  %s548_s3 = inlined_call_operand.vmem [shape: bf16[32,32], index: 3, kind: input, shape index: {}]   ;;  %s549_s4 = inlined_call_operand.vmem [shape: f32[32,1], index: 4, kind: input, shape index: {}]   ;;  %s550_s5 = inlined_call_operand.vmem [shape: f32[32,1], index: 5, kind: input, shape index: {}]   ;;  %s551_s1 = inlined_call_operand.vmem [shape: f32[1,512], index: 1, kind: input, shape index: {}]   ;;  %s552_s2 = inlined_call_operand.vmem [shape: f32[1,512], index: 2, kind: input, shape index: {}]   ;;  %s553_s7 = inlined_call_operand.vmem [shape: f32[1,512], index: 7, kind: output, shape index: {}]  }
   0x1   :  { %v403_v0 = vld [vmem:[%s546_s0 + $0x24] ss:$16 sps:$4 sm:$0xff]   ;;  %154 = vmatprep.mubr.bf16.mxu0 %v419_v1  ;;  %207 = vmatprep.mubr.bf16.mxu1 %v419_v1  ;;  %v12_v2 = vstv %s547_s6  ;;  %v405_v3 = vld [vmem:[%s546_s0 + $0x2c] ss:$16 sps:$4 sm:$0xff]   ;;  %v407_v4 = vld [vmem:[%s546_s0 + $0x20] ss:$16 sps:$4 sm:$0xff]  }
   0x2   :  { %401 = vset.pattern.permute.xlu0 %v419_v1  ;;  %402 = vset.pattern.permute.xlu1 %v419_v1  ;;  %13 = vst [vmem:[#allocation2] sm:$0x1] %v12_v2  ;;  %v408_v5 = vld [vmem:[%s546_s0 + $0x28] ss:$16 sps:$4 sm:$0xff]   ;;  %v409_v6 = vld [vmem:[%s546_s0 + $0x4] ss:$16 sps:$4 sm:$0xff]  }
   0x3   :  { %134 = vmatprep.subr.bf16.mxu0 %v403_v0  ;;  %187 = vmatprep.subr.bf16.mxu1 %v405_v3  ;;  %v411_v7 = vld [vmem:[%s546_s0 + $0xc] ss:$16 sps:$4 sm:$0xff]   ;;  %v413_v8 = vld [vmem:[%s546_s0] ss:$16 sps:$4 sm:$0xff]   ;;  %v414_v9 = vld [vmem:[%s546_s0 + $0x8] ss:$16 sps:$4 sm:$0xff]  }
   0x4   :  { %135 = vmatpush1.bf16.msra.mxu0 %v407_v4  ;;  %188 = vmatpush1.bf16.msra.mxu1 %v408_v5  ;;  %v415_v10 = vld [vmem:[%s548_s3] sm:$0xff]   ;;  %v43_v12 = vld [vmem:[%s549_s4 + $0x10] sm:$0xff]  ;;  %v42_v13 = vld [vmem:[%s549_s4 + $0x8] sm:$0xff] }
   0x5   :  { %136 = vmatprep.subr.bf16.mxu0 %v409_v6  ;;  %189 = vmatprep.subr.bf16.mxu1 %v411_v7  ;;  %v41_v11 = vld [vmem:[%s549_s4] sm:$0xff]  ;;  %v44_v14 = vld [vmem:[%s549_s4 + $0x18] sm:$0xff]  ;;  %v245_v16 = vld [vmem:[%s550_s5 + $0x8] sm:$0xff] }
   0x6   :  { %47 = vperm.xlu0 %401, %v41_v11   ;;  %57 = vperm.xlu1 %402, %v43_v12   ;;  %v244_v15 = vld [vmem:[%s550_s5] sm:$0xff]  ;;  %v416_v17 = vld [vmem:[%s548_s3 + $0x8] sm:$0xff]   ;;  %v246_v18 = vld [vmem:[%s550_s5 + $0x10] sm:$0xff] }
   0x7   :  { %v247_v19 = vld [vmem:[%s550_s5 + $0x18] sm:$0xff]  ;;  %v525_v26 = vld [vmem:[%s551_s1] sm:$0xf] }
   0x8   :  { %137 = vmatpush1.bf16.msra.mxu0 %v413_v8  ;;  %190 = vmatpush1.bf16.msra.mxu1 %v414_v9  ;;  %vm335_vm1 = vcmp.gt.f32.partialorder %v525_v26, 0.5  ;;  %v336_v36 = vld [vmem:[%s552_s2] sm:$0xf] }
   0x9   :  { %v320_v20 = vld [vmem:[#allocation2] sm:$0x1]  ;;  %v533_v46 = vsel %vm335_vm1, %v336_v36, 1.0 }
   0xa   :  { %52 = vperm.xlu0 %401, %v42_v13   ;;  %62 = vperm.xlu1 %402, %v44_v14   ;;  %417 = vrsqrt.f32 %v533_v46  ;;  %vm340_vm2 = vcmp.eq.f32.partialorder %v533_v46, inf  ;;  %vm342_vm3 = vcmp.eq.f32.partialorder %v533_v46, 0.0 }
   0xb   :  { %395 = vmatmul.mubr.msk.bf16.vlgmr.msra.gmra.mxu0 %vm115_vm0, %v415_v10  ;;  %397 = vmatmul.mubr.msk.bf16.vlgmr.msra.gmra.mxu1 %vm115_vm0, %v415_v10 }
   0xc   :  { %164 = vmatprep.mubr.bf16.mxu0 %v419_v1  ;;  %217 = vmatprep.mubr.bf16.mxu1 %v419_v1 }
   0xe   :  { %250 = vperm.xlu0 %401, %v244_v15   ;;  %255 = vperm.xlu1 %402, %v245_v16  }
  0x12   :  { %260 = vperm.xlu0 %401, %v246_v18   ;;  %265 = vperm.xlu1 %402, %v247_v19  }
  0x13   :  { %396 = vmatmul.mubr.msk.bf16.gmra.mxu0 %vm115_vm0, %v416_v17  ;;  %398 = vmatmul.mubr.msk.bf16.gmra.mxu1 %vm115_vm0, %v416_v17 }
  0x16   :  { %323 = vperm.xlu0 %401, %v320_v20  }
  0x81   :  { %v48_v21 = vpop.permute.xlu0 %47  ;;  %v58_v22 = vpop.permute.xlu1 %57 }
  0x85   :  { %v53_v23 = vpop.permute.xlu0 %52  ;;  %v63_v31 = vpop.permute.xlu1 %62 }
  0x89   :  { %v251_v37 = vpop.permute.xlu0 %250  ;;  %v256_v53 = vpop.permute.xlu1 %255 }
  0x8d   :  { %v261_v62 = vpop.permute.xlu0 %260 }
  0xcb   :  { %v156_v24 = vpop.f32.mrf.mxu0  ;;  %v209_v25 = vpop.f32.mrf.mxu1 }
  0xcc   :  { %v157_v27 = vadd.f32 %v156_v24, %v48_v21  ;;  %v210_v28 = vadd.f32 %v209_v25, %v48_v21 }
  0xcd   :  { %v158_v29 = vpop.f32.mrf.mxu0  ;;  %v211_v30 = vpop.f32.mrf.mxu1 }
  0xce   :  { %v159_v32 = vadd.f32 %v158_v29, %v48_v21  ;;  %v212_v33 = vadd.f32 %v211_v30, %v48_v21  ;;  %v228_v38 = vmax.f32 %v157_v27, 0.0  ;;  %v230_v39 = vmax.f32 %v210_v28, 0.0  ;;  %v266_v28 = vpop.permute.xlu1 %265 }
  0xcf   :  { %v160_v34 = vpop.f32.mrf.mxu0  ;;  %v213_v35 = vpop.f32.mrf.mxu1 }
  0xd0   :  { %v161_v40 = vadd.f32 %v160_v34, %v53_v23  ;;  %v214_v41 = vadd.f32 %v213_v35, %v53_v23  ;;  %v229_v47 = vmax.f32 %v159_v32, 0.0  ;;  %v231_v48 = vmax.f32 %v212_v33, 0.0 }
  0xd1   :  { %v162_v42 = vpop.f32.mrf.mxu0  ;;  %v215_v43 = vpop.f32.mrf.mxu1  ;;  %v268_v58 = vmul.f32 %v251_v37, %v228_v38  ;;  %v270_v59 = vmul.f32 %v251_v37, %v230_v39 }
  0xd2   :  { %v163_v44 = vadd.f32 %v162_v42, %v53_v23  ;;  %v216_v45 = vadd.f32 %v215_v43, %v53_v23  ;;  %v232_v49 = vmax.f32 %v161_v40, 0.0  ;;  %v234_v50 = vmax.f32 %v214_v41, 0.0 }
  0xd3   :  { %v166_v51 = vpop.f32.mrf.mxu0  ;;  %v219_v52 = vpop.f32.mrf.mxu1  ;;  %v269_v3 = vmul.f32 %v251_v37, %v229_v47  ;;  %v271_v4 = vmul.f32 %v251_v37, %v231_v48 }
  0xd4   :  { %v233_v54 = vmax.f32 %v163_v44, 0.0  ;;  %v235_v55 = vmax.f32 %v216_v45, 0.0  ;;  %v167_v56 = vadd.f32 %v166_v51, %v58_v22  ;;  %v220_v57 = vadd.f32 %v219_v52, %v58_v22 }
  0xd5   :  { %v168_v60 = vpop.f32.mrf.mxu0  ;;  %v221_v61 = vpop.f32.mrf.mxu1  ;;  %v272_v63 = vmul.f32 %v256_v53, %v232_v49  ;;  %v274_v0 = vmul.f32 %v256_v53, %v234_v50 }
  0xd6   :  { %v236_v1 = vmax.f32 %v167_v56, 0.0  ;;  %v238_v2 = vmax.f32 %v220_v57, 0.0  ;;  %v169_v5 = vadd.f32 %v168_v60, %v58_v22  ;;  %v222_v6 = vadd.f32 %v221_v61, %v58_v22  ;;  %v418_v49 = vpop.eup %417 }
  0xd7   :  { %v170_v7 = vpop.f32.mrf.mxu0  ;;  %v223_v8 = vpop.f32.mrf.mxu1  ;;  %v273_v9 = vmul.f32 %v256_v53, %v233_v54  ;;  %v275_v10 = vmul.f32 %v256_v53, %v235_v55  ;;  %v284_v19 = vadd.f32 %v272_v63, %v268_v58  ;;  %v302_v20 = vadd.f32 %v274_v0, %v270_v59 }
  0xd8   :  { %v276_v11 = vmul.f32 %v261_v62, %v236_v1  ;;  %v278_v12 = vmul.f32 %v261_v62, %v238_v2  ;;  %v237_v13 = vmax.f32 %v169_v5, 0.0  ;;  %v239_v14 = vmax.f32 %v222_v6, 0.0  ;;  %v324_v5 = vpop.permute.xlu0 %323 }
  0xd9   :  { %v171_v15 = vadd.f32 %v170_v7, %v63_v31  ;;  %v224_v16 = vadd.f32 %v223_v8, %v63_v31  ;;  %v172_v17 = vpop.f32.mrf.mxu0  ;;  %v225_v18 = vpop.f32.mrf.mxu1  ;;  %v293_v29 = vadd.f32 %v273_v9, %v269_v3  ;;  %v311_v30 = vadd.f32 %v275_v10, %v271_v4 }
  0xda   :  { %v173_v21 = vadd.f32 %v172_v17, %v63_v31  ;;  %v226_v23 = vadd.f32 %v225_v18, %v63_v31  ;;  %v277_v24 = vmul.f32 %v261_v62, %v237_v13  ;;  %v279_v25 = vmul.f32 %v261_v62, %v239_v14 }
  0xdb   :  { %v240_v27 = vmax.f32 %v171_v15, 0.0  ;;  %v242_v22 = vmax.f32 %v224_v16, 0.0  ;;  %v285_v34 = vadd.f32 %v284_v19, %v276_v11  ;;  %v303_v35 = vadd.f32 %v302_v20, %v278_v12 }
  0xdc   :  { %v241_v32 = vmax.f32 %v173_v21, 0.0  ;;  %v243_v33 = vmax.f32 %v226_v23, 0.0  ;;  %v294_v38 = vadd.f32 %v293_v29, %v277_v24  ;;  %v312_v39 = vadd.f32 %v311_v30, %v279_v25 }
  0xdd   :  { %v280_v36 = vmul.f32 %v266_v28, %v240_v27  ;;  %v282_v37 = vmul.f32 %v266_v28, %v242_v22  ;;  %v326_v31 = vlaneseq  ;;  %v420_v57 = vmov 1966171168  }
  0xde   :  { %v281_v40 = vmul.f32 %v266_v28, %v241_v32  ;;  %v283_v41 = vmul.f32 %v266_v28, %v243_v33  ;;  %v353_v58 = vunpack.c.l.s4 %v420_v57  ;;  %v339_v8 = vmul.f32 %v418_v49, %v533_v46 }
  0xdf   :  { %v286_v42 = vadd.f32 %v285_v34, %v280_v36  ;;  %v304_v43 = vadd.f32 %v303_v35, %v282_v37  ;;  %v327_v54 = vshrl.u32 %v326_v31, 7  ;;  %v343_v18 = vand.u32 2147483648, %v533_v46 }
  0xe0   :  { %v295_v44 = vadd.f32 %v294_v38, %v281_v40  ;;  %v313_v45 = vadd.f32 %v312_v39, %v283_v41  ;;  %v354_v4 = vunpack.c.0.s8 %v353_v58  ;;  %v341_v17 = vsel %vm340_vm2, %v533_v46, %v339_v8 }
  0xe1   :  { %v287_v47 = vrot.slane %v286_v42, 4  ;;  %v305_v48 = vrot.slane %v304_v43, 4  ;;  %v328_v1 = vsub.s32 0, %v327_v54  ;;  %v344_v27 = vsel %vm342_vm3, %v343_v18, %v341_v17 }
  0xe2   :  { %v296_v50 = vrot.slane %v295_v44, 4  ;;  %v314_v51 = vrot.slane %v313_v45, 4  ;;  %v357_v16 = vsub.s32 %v354_v4, %v327_v54  ;;  %v345_v29 = vmul.f32 0.5, %v344_v27 }
  0xe3   :  { %v288_v52 = vadd.f32 %v287_v47, %v286_v42  ;;  %v306_v53 = vadd.f32 %v305_v48, %v304_v43  ;;  %v329_v13 = vrot.slane %v324_v5, %v328_v1  ;;  %vm378_vm4 = vcmp.lt.s32.totalorder %v326_v31, 512 }
  0xe4   :  { %v297_v55 = vadd.f32 %v296_v50, %v295_v44  ;;  %v315_v56 = vadd.f32 %v314_v51, %v313_v45 }
  0xe5   :  { %v289_v59 = vrot.slane %v288_v52, 2  ;;  %v307_v60 = vrot.slane %v306_v53, 2 }
  0xe6   :  { %v298_v61 = vrot.slane %v297_v55, 2  ;;  %v316_v62 = vrot.slane %v315_v56, 2 }
  0xe7   :  { %v290_v63 = vadd.f32 %v289_v59, %v288_v52  ;;  %v308_v0 = vadd.f32 %v307_v60, %v306_v53 }
  0xe8   :  { %v299_v2 = vadd.f32 %v298_v61, %v297_v55  ;;  %v317_v3 = vadd.f32 %v316_v62, %v315_v56 }
  0xe9   :  { %v291_v6 = vrot.slane %v290_v63, 1  ;;  %v309_v7 = vrot.slane %v308_v0, 1 }
  0xea   :  { %v300_v9 = vrot.slane %v299_v2, 1  ;;  %v318_v10 = vrot.slane %v317_v3, 1 }
  0xeb   :  { %v292_v11 = vadd.f32 %v291_v6, %v290_v63  ;;  %v310_v12 = vadd.f32 %v309_v7, %v308_v0 }
  0xec   :  { %v301_v14 = vadd.f32 %v300_v9, %v299_v2  ;;  %v319_v15 = vadd.f32 %v318_v10, %v317_v3 }
  0xed   :  { %v330_v19 = vadd.f32 %v329_v13, %v292_v11  ;;  %v332_v20 = vadd.f32 %v329_v13, %v310_v12 }
  0xee   :  { %v331_v21 = vadd.f32 %v329_v13, %v301_v14  ;;  %v333_v23 = vadd.f32 %v329_v13, %v319_v15 }
  0xf0   :  { %v350_v24 = vcombine.low %v330_v19, %v331_v21  ;;  %v351_v25 = vcombine.low %v332_v20, %v333_v23 }
  0xf2   :  { %v358_v22 = vrot.slane %v350_v24, %v357_v16  ;;  %v365_v28 = vrot.slane %v351_v25, %v357_v16 }
  0xf4   :  { %v366_v30 = vcombine.low %v358_v22, %v365_v28 }
  0xf6   :  { %v373_v32 = vrot.slane %v366_v30, %v357_v16 }
  0xf8   :  { %v375_v33 = vsel %vm335_vm1, %v345_v29, %v373_v32 }
  0xf9   :  { %380 = vst.msk [vmem:[%s553_s7] sm:$0xf] %vm378_vm4, %v375_v33 }

</bundles_post_ra>
